<compile_context>
chip_gen: v7x
topology: tpu7x:2x2x1
jax: 0.10.0
libtpu: 0.0.40
codegen_flags: <defaults>
</compile_context>

<pallas_src>
import jax
import jax.numpy as jnp
from jax import lax
from jax.experimental import pallas as pl
from jax.experimental.pallas import tpu as pltpu


def _round_up(v, m):
    return (v + m - 1) // m * m


# ----------------------------- Fused Pallas kernel ---------------------------

def _make_fused_stack_kernel(tm, tk, apply_l2norm):
    """Kernel over grid (layer, row_tile, k_tile); reduction (k) axis is last."""

    def kernel(a_ref, x_ref, w_ref, b_ref, o_ref, x_scr, h_scr, acc_ref):
        l = pl.program_id(0)
        i = pl.program_id(1)
        k = pl.program_id(2)
        nl = pl.num_programs(0)
        nk = pl.num_programs(2)

        # ---- one-time prologue: stage padded node features into VMEM scratch.
        @pl.when((l == 0) & (i == 0) & (k == 0))
        def _():
            x_scr[...] = x_ref[...]

        # ---- per-layer prologue: H_l = X_l @ W_l, computed ONCE per layer.
        # (After this, X_l is no longer needed, so row epilogues may overwrite
        #  x_scr in place with the layer output.)
        @pl.when((i == 0) & (k == 0))
        def _():
            h_scr[...] = jnp.dot(
                x_scr[...].astype(jnp.bfloat16), w_ref[0],
                preferred_element_type=jnp.float32).astype(h_scr.dtype)

        # ---- accumulator init for this (layer, row_tile).
        @pl.when(k == 0)
        def _():
            acc_ref[...] = jnp.zeros_like(acc_ref)

        # ---- inner loop body: pure MXU accumulate  acc += A[i,k] @ H[k].
        koff = pl.multiple_of(k * tk, tk)
        acc_ref[...] += jnp.dot(
            a_ref[...], h_scr[pl.ds(koff, tk), :],
            preferred_element_type=jnp.float32)

        # ---- row-tile epilogue (last k): bias + ReLU (+ fused L2 norm).
        @pl.when(k == nk - 1)
        def _():
            y = jnp.maximum(acc_ref[...] + b_ref[0], 0.0)   # f32
            roff = pl.multiple_of(i * tm, tm)
            x_scr[pl.ds(roff, tm), :] = y                   # next layer's input

            @pl.when(l == nl - 1)
            def _():
                if apply_l2norm:
                    # F.normalize(p=2, dim=-1, eps=1e-12) == x * rsqrt(max(sq, eps^2))
                    sq = jnp.sum(y * y, axis=-1, keepdims=True)
                    inv = lax.rsqrt(jnp.maximum(sq, 1e-24))
                    o_ref[...] = (y * inv).astype(o_ref.dtype)
                else:
                    o_ref[...] = y.astype(o_ref.dtype)

            @pl.when(l < nl - 1)
            def _():
                # Keep the (revisited) output block defined; overwritten by the
                # final layer for the same row range.
                o_ref[...] = y.astype(o_ref.dtype)

    return kernel


# ----------------------------- Wrapper ---------------------------------------

def gnn_stack_forward(a_hat, x, weights, biases, *, apply_l2norm=True,
                      lane_pad=128, max_tile=128):
    """Fused forward of the whole GNN stack (+ optional l2norm)."""
    n, d_in = x.shape
    num_layers = len(weights)
    d_out = weights[-1].shape[1]
    assert d_in <= lane_pad and d_out <= lane_pad, "feature dims must be <= 128 here"

    dp = _round_up(max(d_in, d_out, 1), lane_pad)      # lane-dense feature dim
    tile = min(max_tile, _round_up(n, 8))              # tm == tk
    n_pad = _round_up(n, tile)
    tm = tk = tile

    # ---- pad / cast inputs (bf16 for MXU operands, f32 elsewhere).
    a_p = jnp.zeros((n_pad, n_pad), jnp.bfloat16).at[:n, :n].set(
        a_hat.astype(jnp.bfloat16))
    x_p = jnp.zeros((n_pad, dp), jnp.float32).at[:n, :d_in].set(
        x.astype(jnp.float32))

    w_list, b_list = [], []
    for w, b in zip(weights, biases):
        wi, wo = w.shape
        w_list.append(jnp.zeros((dp, dp), jnp.bfloat16).at[:wi, :wo].set(
            w.astype(jnp.bfloat16)))
        b_list.append(jnp.zeros((1, dp), jnp.float32).at[:, :wo].set(
            b.astype(jnp.float32)))
    w_all = jnp.stack(w_list)     # [L, dp, dp] bf16
    b_all = jnp.stack(b_list)     # [L, 1, dp]  f32

    # ---- advisory cost estimate for the XLA scheduler.
    flops = num_layers * (2 * n_pad * dp * dp + 2 * n_pad * n_pad * dp)
    bytes_accessed = (num_layers * n_pad * n_pad * 2     # A_hat re-read per layer
                      + n_pad * dp * 4                   # x in
                      + num_layers * (dp * dp * 2 + dp * 4)
                      + num_layers * n_pad * dp * 4)     # output writebacks
    cost = pl.CostEstimate(flops=flops, transcendentals=n_pad,
                           bytes_accessed=bytes_accessed)

    grid = (num_layers, n_pad // tm, n_pad // tk)

    out_p = pl.pallas_call(
        _make_fused_stack_kernel(tm, tk, apply_l2norm),
        out_shape=jax.ShapeDtypeStruct((n_pad, dp), jnp.float32),
        grid_spec=pltpu.PrefetchScalarGridSpec(
            num_scalar_prefetch=0,
            grid=grid,
            in_specs=[
                pl.BlockSpec((tm, tk), lambda l, i, k: (i, k)),       # A_hat tile
                pl.BlockSpec((n_pad, dp), lambda l, i, k: (0, 0)),    # X (resident)
                pl.BlockSpec((1, dp, dp), lambda l, i, k: (l, 0, 0)),  # W_l
                pl.BlockSpec((1, 1, dp), lambda l, i, k: (l, 0, 0)),   # b_l
            ],
            out_specs=pl.BlockSpec((tm, dp), lambda l, i, k: (i, 0)),
            scratch_shapes=[
                pltpu.VMEM((n_pad, dp), jnp.float32),   # X (current layer input/output)
                pltpu.VMEM((n_pad, dp), jnp.bfloat16),  # H = X @ W (per layer)
                pltpu.VMEM((tm, dp), jnp.float32),      # f32 accumulator
            ],
        ),
        # Row axis must stay "arbitrary": the fused stack has cross-row-tile
        # dependencies through the VMEM scratch (H prologue, next-layer input).
        compiler_params=pltpu.CompilerParams(
            dimension_semantics=("arbitrary", "arbitrary", "arbitrary")),
        cost_estimate=cost,
    )(a_p, x_p, w_all, b_all)

    return out_p[:n, :d_out]


class GNNStackStage:
    """Pallas equivalent of the PyTorch GNNStackStage (stacked graph-conv path)."""

    def __init__(self, dim_in, dim_out, num_layers, l2norm_flag=True,
                 key=jax.random.PRNGKey(0)):
        self.dim_out = dim_out
        self.l2norm = l2norm_flag
        self.params = []
        for i in range(num_layers):
            d_in = dim_in if i == 0 else dim_out
            key, wk, bk = jax.random.split(key, 3)
            w = jax.random.normal(wk, (d_in, dim_out), jnp.float32)
            w = w * (1.0 / jnp.sqrt(jnp.float32(d_in)))
            b = 0.01 * jax.random.normal(bk, (1, dim_out), jnp.float32)
            self.params.append((w, b))

    def __call__(self, a_hat, node_feature):
        weights = [w for (w, _) in self.params]
        biases = [b for (_, b) in self.params]
        return gnn_stack_forward(a_hat, node_feature, weights, biases,
                                 apply_l2norm=self.l2norm)


# ----------------------------- Reference & glue -------------------------------

def build_normalized_adjacency(key, n):
    """Random symmetric adjacency with self-loops, symmetric normalization."""
    a = (jax.random.uniform(key, (n, n)) < 0.1).astype(jnp.float32)
    a = jnp.maximum(a, a.T)
    a = a + jnp.eye(n, dtype=jnp.float32)
    deg = jnp.sum(a, axis=-1)
    d_inv_sqrt = 1.0 / jnp.sqrt(jnp.maximum(deg, 1.0))
    return a * d_inv_sqrt[:, None] * d_inv_sqrt[None, :]


def reference_forward(a_hat, x, weights, biases, l2norm_flag):
    """Pure-JAX reference mirroring the kernel's bf16 MXU operands."""
    a = a_hat.astype(jnp.bfloat16).astype(jnp.float32)
    h = x.astype(jnp.float32)
    for w, b in zip(weights, biases):
        wb = w.astype(jnp.bfloat16).astype(jnp.float32)
        hh = jnp.dot(h.astype(jnp.bfloat16).astype(jnp.float32), wb)
        hh = hh.astype(jnp.bfloat16).astype(jnp.float32)   # kernel stores H in bf16
        h = jnp.maximum(jnp.dot(a, hh) + b, 0.0)
    if l2norm_flag:
        nrm = jnp.sqrt(jnp.sum(h * h, axis=-1, keepdims=True))
        h = h / jnp.maximum(nrm, 1e-12)
    return h


# ----------------------------- Main -------------------------------------------

if __name__ == "__main__":
    key = jax.random.PRNGKey(0)
    k_adj, k_x, k_params = jax.random.split(key, 3)

    N, D_IN, D_OUT, NUM_LAYERS = 256, 32, 32, 2   # exercises a (2, 2, 2) grid

    a_hat = build_normalized_adjacency(k_adj, N)
    x = jax.random.normal(k_x, (N, D_IN), jnp.float32)

    stage = GNNStackStage(D_IN, D_OUT, NUM_LAYERS, l2norm_flag=True, key=k_params)
    out = jax.block_until_ready(stage(a_hat, x))

    assert out.shape == (N, D_OUT), out.shape

    ref = jax.block_until_ready(
        reference_forward(a_hat, x,
                          [w for (w, _) in stage.params],
                          [b for (_, b) in stage.params],
                          True))
    max_err = float(jnp.max(jnp.abs(out - ref)))
    assert jnp.allclose(out, ref, atol=3e-2, rtol=3e-2), max_err

    print("KERNEL_OK")
</pallas_src>

<mosaic_0001>
module attributes {stable_mosaic.version = 11 : i64} {
  func.func @kernel(%arg0: i32, %arg1: i32, %arg2: i32, %arg3: memref<128x128xbf16, #tpu.memory_space<vmem>>, %arg4: memref<256x128xf32, #tpu.memory_space<vmem>>, %arg5: memref<1x128x128xbf16, #tpu.memory_space<vmem>>, %arg6: memref<1x1x128xf32, #tpu.memory_space<vmem>>, %arg7: memref<128x128xf32, #tpu.memory_space<vmem>>, %arg8: memref<256x128xf32, #tpu.memory_space<vmem>>, %arg9: memref<256x128xbf16, #tpu.memory_space<vmem>>, %arg10: memref<128x128xf32, #tpu.memory_space<vmem>>) attributes {dimension_semantics = [#tpu.dimension_semantics<arbitrary>, #tpu.dimension_semantics<arbitrary>, #tpu.dimension_semantics<arbitrary>], iteration_bounds = array<i64: 2, 2, 2>, scalar_prefetch = 0 : i64, scratch_operands = 3 : i64, tpu.core_type = #tpu.core_type<tc>, window_params = [{transform_indices = @transform_0, window_bounds = array<i64: 128, 128>}, {pipeline_mode = #tpu.pipeline_mode<synchronous>, transform_indices = @transform_1, window_bounds = array<i64: 256, 128>}, {transform_indices = @transform_2, window_bounds = array<i64: 1, 128, 128>}, {transform_indices = @transform_3, window_bounds = array<i64: 1, 1, 128>}, {transform_indices = @transform_4, window_bounds = array<i64: 128, 128>}]} {
    %c0_i32 = arith.constant 0 : i32
    %0 = arith.cmpi eq, %arg0, %c0_i32 : i32
    %c0_i32_0 = arith.constant 0 : i32
    %1 = arith.cmpi eq, %arg1, %c0_i32_0 : i32
    %2 = arith.andi %0, %1 : i1
    %c0_i32_1 = arith.constant 0 : i32
    %3 = arith.cmpi eq, %arg2, %c0_i32_1 : i32
    %4 = arith.andi %2, %3 : i1
    %5 = arith.extui %4 : i1 to i32
    %c0_i32_2 = arith.constant 0 : i32
    %6 = arith.cmpi ne, %5, %c0_i32_2 : i32
    scf.if %6 {
      %c0_15 = arith.constant 0 : index
      %c0_16 = arith.constant 0 : index
      %27 = vector.load %arg4[%c0_15, %c0_16] : memref<256x128xf32, #tpu.memory_space<vmem>>, vector<256x128xf32>
      %c0_17 = arith.constant 0 : index
      %c0_18 = arith.constant 0 : index
      %28 = vector.load %arg8[%c0_17, %c0_18] : memref<256x128xf32, #tpu.memory_space<vmem>>, vector<256x128xf32>
      tpu.vector_store %arg8[%c0_17, %c0_18], %27 {strides = array<i32>} : memref<256x128xf32, #tpu.memory_space<vmem>>, vector<256x128xf32>,
    } else {
    }
    %c0_i32_3 = arith.constant 0 : i32
    %7 = arith.cmpi eq, %arg1, %c0_i32_3 : i32
    %c0_i32_4 = arith.constant 0 : i32
    %8 = arith.cmpi eq, %arg2, %c0_i32_4 : i32
    %9 = arith.andi %7, %8 : i1
    %10 = arith.extui %9 : i1 to i32
    %c0_i32_5 = arith.constant 0 : i32
    %11 = arith.cmpi ne, %10, %c0_i32_5 : i32
    scf.if %11 {
      %c0_15 = arith.constant 0 : index
      %c0_16 = arith.constant 0 : index
      %27 = vector.load %arg8[%c0_15, %c0_16] : memref<256x128xf32, #tpu.memory_space<vmem>>, vector<256x128xf32>
      %28 = arith.truncf %27 : vector<256x128xf32> to vector<256x128xbf16>
      %c0_17 = arith.constant 0 : index
      %c0_18 = arith.constant 0 : index
      %c0_19 = arith.constant 0 : index
      %29 = vector.load %arg5[%c0_17, %c0_18, %c0_19] : memref<1x128x128xbf16, #tpu.memory_space<vmem>>, vector<1x128x128xbf16>
      %30 = vector.shape_cast %29 : vector<1x128x128xbf16> to vector<128x128xbf16>
      %cst_20 = arith.constant dense<0.000000e+00> : vector<256x128xf32>
      %31 = tpu.matmul %28, %30, %cst_20 {dimension_numbers = #tpu.dot_dimension_numbers<[1], [0], [0], [1], [0, 0, 1, 1], [], []>} : vector<256x128xbf16>, vector<128x128xbf16>, vector<256x128xf32> -> vector<256x128xf32>
      %32 = arith.truncf %31 : vector<256x128xf32> to vector<256x128xbf16>
      %c0_21 = arith.constant 0 : index
      %c0_22 = arith.constant 0 : index
      %33 = vector.load %arg9[%c0_21, %c0_22] : memref<256x128xbf16, #tpu.memory_space<vmem>>, vector<256x128xbf16>
      tpu.vector_store %arg9[%c0_21, %c0_22], %32 {strides = array<i32>} : memref<256x128xbf16, #tpu.memory_space<vmem>>, vector<256x128xbf16>,
    } else {
    }
    %c0_i32_6 = arith.constant 0 : i32
    %12 = arith.cmpi eq, %arg2, %c0_i32_6 : i32
    %13 = arith.extui %12 : i1 to i32
    %c0_i32_7 = arith.constant 0 : i32
    %14 = arith.cmpi ne, %13, %c0_i32_7 : i32
    scf.if %14 {
      %cst_15 = arith.constant 0.000000e+00 : f32
      %27 = vector.broadcast %cst_15 : f32 to vector<128x128xf32>
      %c0_16 = arith.constant 0 : index
      %c0_17 = arith.constant 0 : index
      %28 = vector.load %arg10[%c0_16, %c0_17] : memref<128x128xf32, #tpu.memory_space<vmem>>, vector<128x128xf32>
      tpu.vector_store %arg10[%c0_16, %c0_17], %27 {strides = array<i32>} : memref<128x128xf32, #tpu.memory_space<vmem>>, vector<128x128xf32>,
    } else {
    }
    %c128_i32 = arith.constant 128 : i32
    %15 = arith.muli %arg2, %c128_i32 : i32
    %16 = tpu.assume_multiple %15, 128 : i32
    %c0 = arith.constant 0 : index
    %c0_8 = arith.constant 0 : index
    %17 = vector.load %arg10[%c0, %c0_8] : memref<128x128xf32, #tpu.memory_space<vmem>>, vector<128x128xf32>
    %c0_9 = arith.constant 0 : index
    %c0_10 = arith.constant 0 : index
    %18 = vector.load %arg3[%c0_9, %c0_10] : memref<128x128xbf16, #tpu.memory_space<vmem>>, vector<128x128xbf16>
    %19 = arith.index_cast %16 : i32 to index
    %c0_11 = arith.constant 0 : index
    %20 = vector.load %arg9[%19, %c0_11] : memref<256x128xbf16, #tpu.memory_space<vmem>>, vector<128x128xbf16>
    %cst = arith.constant dense<0.000000e+00> : vector<128x128xf32>
    %21 = tpu.matmul %18, %20, %cst {dimension_numbers = #tpu.dot_dimension_numbers<[1], [0], [0], [1], [0, 0, 1, 1], [], []>} : vector<128x128xbf16>, vector<128x128xbf16>, vector<128x128xf32> -> vector<128x128xf32>
    %22 = arith.addf %17, %21 : vector<128x128xf32>
    %c0_12 = arith.constant 0 : index
    %c0_13 = arith.constant 0 : index
    %23 = vector.load %arg10[%c0_12, %c0_13] : memref<128x128xf32, #tpu.memory_space<vmem>>, vector<128x128xf32>
    tpu.vector_store %arg10[%c0_12, %c0_13], %22 {strides = array<i32>} : memref<128x128xf32, #tpu.memory_space<vmem>>, vector<128x128xf32>,
    %c1_i32 = arith.constant 1 : i32
    %24 = arith.cmpi eq, %arg2, %c1_i32 : i32
    %25 = arith.extui %24 : i1 to i32
    %c0_i32_14 = arith.constant 0 : i32
    %26 = arith.cmpi ne, %25, %c0_i32_14 : i32
    scf.if %26 {
      %c0_15 = arith.constant 0 : index
      %c0_16 = arith.constant 0 : index
      %27 = vector.load %arg10[%c0_15, %c0_16] : memref<128x128xf32, #tpu.memory_space<vmem>>, vector<128x128xf32>
      %c0_17 = arith.constant 0 : index
      %c0_18 = arith.constant 0 : index
      %c0_19 = arith.constant 0 : index
      %28 = vector.load %arg6[%c0_17, %c0_18, %c0_19] : memref<1x1x128xf32, #tpu.memory_space<vmem>>, vector<1x1x128xf32>
      %29 = vector.shape_cast %28 : vector<1x1x128xf32> to vector<1x128xf32>
      %30 = vector.broadcast %29 : vector<1x128xf32> to vector<128x128xf32>
      %31 = arith.addf %27, %30 : vector<128x128xf32>
      %cst_20 = arith.constant 0.000000e+00 : f32
      %32 = vector.broadcast %cst_20 : f32 to vector<128x128xf32>
      %33 = arith.maximumf %31, %32 : vector<128x128xf32>
      %c128_i32_21 = arith.constant 128 : i32
      %34 = arith.muli %arg1, %c128_i32_21 : i32
      %35 = tpu.assume_multiple %34, 128 : i32
      %36 = arith.index_cast %35 : i32 to index
      %c0_22 = arith.constant 0 : index
      %37 = vector.load %arg8[%36, %c0_22] : memref<256x128xf32, #tpu.memory_space<vmem>>, vector<128x128xf32>
      tpu.vector_store %arg8[%36, %c0_22], %33 {strides = array<i32>} : memref<256x128xf32, #tpu.memory_space<vmem>>, vector<128x128xf32>,
      %c1_i32_23 = arith.constant 1 : i32
      %38 = arith.cmpi eq, %arg0, %c1_i32_23 : i32
      %39 = arith.extui %38 : i1 to i32
      %c0_i32_24 = arith.constant 0 : i32
      %40 = arith.cmpi ne, %39, %c0_i32_24 : i32
      scf.if %40 {
        %44 = arith.mulf %33, %33 : vector<128x128xf32>
        %cst_27 = arith.constant dense<0.000000e+00> : vector<128xf32>
        %45 = vector.multi_reduction <add>, %44, %cst_27 [1] : vector<128x128xf32> to vector<128xf32>
        %46 = vector.shape_cast %45 : vector<128xf32> to vector<128x1xf32>
        %cst_28 = arith.constant 1.000000e-24 : f32
        %47 = vector.broadcast %cst_28 : f32 to vector<128x1xf32>
        %48 = arith.maximumf %46, %47 : vector<128x1xf32>
        %49 = math.rsqrt %48 : vector<128x1xf32>
        %50 = vector.broadcast %49 : vector<128x1xf32> to vector<128x128xf32>
        %51 = arith.mulf %33, %50 : vector<128x128xf32>
        %c0_29 = arith.constant 0 : index
        %c0_30 = arith.constant 0 : index
        %52 = vector.load %arg7[%c0_29, %c0_30] : memref<128x128xf32, #tpu.memory_space<vmem>>, vector<128x128xf32>
        tpu.vector_store %arg7[%c0_29, %c0_30], %51 {strides = array<i32>} : memref<128x128xf32, #tpu.memory_space<vmem>>, vector<128x128xf32>,
      } else {
      }
      %c1_i32_25 = arith.constant 1 : i32
      %41 = arith.cmpi slt, %arg0, %c1_i32_25 : i32
      %42 = arith.extui %41 : i1 to i32
      %c0_i32_26 = arith.constant 0 : i32
      %43 = arith.cmpi ne, %42, %c0_i32_26 : i32
      scf.if %43 {
        %c0_27 = arith.constant 0 : index
        %c0_28 = arith.constant 0 : index
        %44 = vector.load %arg7[%c0_27, %c0_28] : memref<128x128xf32, #tpu.memory_space<vmem>>, vector<128x128xf32>
        tpu.vector_store %arg7[%c0_27, %c0_28], %33 {strides = array<i32>} : memref<128x128xf32, #tpu.memory_space<vmem>>, vector<128x128xf32>,
      } else {
      }
    } else {
    }
    return
  }
  func.func @transform_0(%arg0: i32, %arg1: i32, %arg2: i32) -> (i32, i32) {
    %c0_i32 = arith.constant 0 : i32
    return %arg1, %arg2 : i32, i32
  }
  func.func @transform_1(%arg0: i32, %arg1: i32, %arg2: i32) -> (i32, i32) {
    %c0_i32 = arith.constant 0 : i32
    %c0_i32_0 = arith.constant 0 : i32
    %c0_i32_1 = arith.constant 0 : i32
    return %c0_i32, %c0_i32_0 : i32, i32
  }
  func.func @transform_2(%arg0: i32, %arg1: i32, %arg2: i32) -> (i32, i32, i32) {
    %c0_i32 = arith.constant 0 : i32
    %c0_i32_0 = arith.constant 0 : i32
    %c0_i32_1 = arith.constant 0 : i32
    return %arg0, %c0_i32, %c0_i32_0 : i32, i32, i32
  }
  func.func @transform_3(%arg0: i32, %arg1: i32, %arg2: i32) -> (i32, i32, i32) {
    %c0_i32 = arith.constant 0 : i32
    %c0_i32_0 = arith.constant 0 : i32
    %c0_i32_1 = arith.constant 0 : i32
    return %arg0, %c0_i32, %c0_i32_0 : i32, i32, i32
  }
  func.func @transform_4(%arg0: i32, %arg1: i32, %arg2: i32) -> (i32, i32) {
    %c0_i32 = arith.constant 0 : i32
    %c0_i32_0 = arith.constant 0 : i32
    return %arg1, %c0_i32 : i32, i32
  }
}

</mosaic_0001>

<bundles_post_ra>
// kernel: tpu_custom_call.1
= control target key start
LH: loop header
LB: loop body
LE: loop exit
PB: predicated region body
PF: predicated region fallthrough
CT: control target
= control target key end

     0   :  { %s2637_s0 = inlined_call_operand.hbm [shape: bf16[256,256], index: 0, kind: input, shape index: {}]   ;;  %s2638_s1 = inlined_call_operand.hbm [shape: f32[256,128], index: 1, kind: input, shape index: {}]   ;;  %s2639_s2 = inlined_call_operand.hbm [shape: bf16[2,128,128], index: 2, kind: input, shape index: {}]   ;;  %s2640_s3 = inlined_call_operand.vmem [shape: f32[2,1,128], index: 3, kind: input, shape index: {}]   ;;  %s2641_s4 = inlined_call_operand.hbm [shape: f32[256,128], index: 4, kind: output, shape index: {}]  }
   0x1   :  { %2665 = sst [smem:[#allocation25_spill]] %s2637_s0 }
   0x2   :  { %2666 = sst [smem:[#allocation26_spill]] %s2639_s2 }
   0x3   :  { %2667 = sst [smem:[#allocation27_spill]] %s2640_s3 }
   0x4   :  { %2668 = sst [smem:[#allocation28_spill]] %s2641_s4 }
   0x5   :  { %9 = vsyncpa [#allocation6], 0 }
   0x6   :  { %11 = vsyncpa [#allocation6 + $0x1], 0 }
   0x7   :  { %12 = vsyncpa [#allocation9], 0 }
   0x8   :  { %13 = vsyncpa [#allocation7], 0 }
   0x9   :  { %15 = vsyncpa [#allocation7 + $0x1], 0  ;;  %s2003_s15 = smov 0   ;;  %s2005_s16 = smov 0  }
   0xa   :  { %s2007_s17 = smov 0   ;;  %s2009_s18 = smov 0  }
   0xb   :  { %s2011_s19 = smov 0   ;;  %s2013_s20 = smov 0  }
   0xc   :  { %s2015_s21 = smov 0   ;;  %s2017_s22 = smov 0  }
   0xd   :  { %s2019_s23 = smov 0   ;;  %s2021_s24 = smov 0  }
   0xe   :  { %s2023_s25 = smov 0   ;;  %s2025_s26 = smov 0  }
   0xf   :  { %s2027_s27 = smov 0   ;;  %s2029_s28 = smov 0  }
  0x10   :  { %s2031_s29 = smov 0   ;;  %s2033_s30 = smov 0  }
  0x11 LB: > { %2669 = sst [smem:[#allocation16_spill]] %s1925_s20  ;;  %s33_s5 = sadd.s32 1, %s1953_s27  ;;  %s1965_s30 = sphi %s2033_s30, %s21_s30   ;;  %s1961_s29 = sphi %s2031_s29, %s2735_s29   ;;  %s1957_s28 = sphi %s2029_s28, %s2724_s28   ;;  %s1953_s27 = sphi %s2027_s27, %s2723_s27   ;;  %s1949_s26 = sphi %s2025_s26, %s2734_s26   ;;  %s1945_s25 = sphi %s2023_s25, %s2722_s25   ;;  %s1941_s24 = sphi %s2021_s24, %s2721_s24   ;;  %s1937_s23 = sphi %s2019_s23, %s2733_s23   ;;  %s1933_s22 = sphi %s2017_s22, %s2732_s22   ;;  %s1929_s21 = sphi %s2015_s21, %s2731_s21   ;;  %s1925_s20 = sphi %s2013_s20, %s2730_s20   ;;  %s1921_s19 = sphi %s2011_s19, %s2729_s19   ;;  %s1917_s18 = sphi %s2009_s18, %s2728_s18   ;;  %s1913_s17 = sphi %s2007_s17, %s2727_s17   ;;  %s1909_s16 = sphi %s2005_s16, %s2726_s16   ;;  %s1905_s15 = sphi %s2003_s15, %s2725_s15  }
  0x12   : > { %2670 = sst [smem:[#allocation17_spill]] %s1941_s24  ;;  %s36_s6 = sadd.s32 1, %s1957_s28 }
  0x13   : > { %2671 = sst [smem:[#allocation18_spill]] %s1945_s25  ;;  %p34_p0 = scmp.ge.s32.totalorder %s33_s5, 2 }
  0x14   : > { %2672 = sst [smem:[#allocation19_spill]] %s1949_s26  ;;  %s49_s7 = sadd.s32 1, %s1937_s23 }
  0x15   : > { %2673 = sst [smem:[#allocation20_spill]] %s1953_s27  ;;  %p56_p1 = scmp.ne.s32.totalorder %s1937_s23, %s1933_s22 }
  0x16   : > { %2674 = sst [smem:[#allocation21_spill]] %s1957_s28  ;;  %p2653_p2 = scmp.eq.s32.totalorder %s1965_s30, 0 }
  0x17   : > { %s2737_s5 = smov (%p34_p0, %s33_s5), 0  ;;  %s2739_s6 = smov (!%p34_p0, %s36_s6), %s1957_s28 }
  0x18   : > { %2675 = sst [smem:[#allocation22_spill]] %s2737_s5  ;;  %s45_s8 = ssub.s32 %s1953_s27, %s2737_s5 }
  0x19   : > { %2676 = sst [smem:[#allocation23_spill]] %s2739_s6  ;;  %p2098_p3 = por %p2653_p2, %p56_p1 }
  0x1a   : > { %p2654_p4 = scmp.ge.s32.totalorder %s2739_s6, 2  ;;  %p2652_p5 = scmp.lt.s32.totalorder %s1965_s30, 8 }
  0x1b   : > { %s198_s11 = sand.u32 1, %s1965_s30   ;;  %s200_s12 = sand.u32 1, %s1937_s23  }
  0x1c   : > { %s2107_s10 = scalar_select %p2654_p4, 0, %s2739_s6  }
  0x1d   : > { %s1298_s5 = sshll.u32 %s200_s12, 6  ;;  %s1339_s4 = sshll.u32 %s1957_s28, 5 }
  0x1e   : > { %2678 = sst [smem:[#allocation24_spill]] %s2107_s10  ;;  %s2113_s13 = ssub.s32 %s1957_s28, %s2107_s10 }
  0x1f   : > { %s46_s14 = sor.u32 %s45_s8, %s2113_s13  ;;  %p146_p6 = scmp.eq.s32.totalorder %s2113_s13, 0 }
  0x20   : > { %p47_p7 = scmp.eq.s32.totalorder %s46_s14, 0  ;;  %s208_s24 = sadd.s32 %s1953_s27, %s1339_s4 }
  0x21   : > { %s202_s25 = scalar_lea.vmem [#allocation5], %s1298_s5  ;;  %s1301_s2 = sshll.u32 %s208_s24, 6 }
  0x22   : > { %s2119_s3 = scalar_select %p47_p7, %s1937_s23, %s49_s7  }
  0x23   : > { %s211_s26 = sshll.u32 %s202_s25, 4  ;;  %s2679_s0 = sld [smem:[#allocation25_spill]]  ;;  %s2122_s26 = int_to_ptr.vmem [resolvable:$true] %s211_s26 }
  0x24   : > { %p2133_p8 = pnand %p2652_p5, %p2098_p3  ;;  %s2137_s4 = scalar_lea.sflag [#allocation6], %s198_s11 }
  0x26   : > { %p1709_p10 = pneg %p2133_p8 }
  0x29   : > { %s2127_s10 = scalar_lea.hbm %s2679_s0, %s1301_s2  ;;  %s1712_s25 = scalar_lea.hbm %s2679_s0, 4096 }
  0x2a   : > { %s1707_s24 = scalar_lea.hbm %s2127_s10, 1024  ;;  %p1713_p13 = scmp.lt.u32.totalorder %s2127_s10, %s2679_s0 }
  0x2b   : > { %p1708_p9 = scmp.ne.s32.totalorder %s2127_s10, %s1707_s24  ;;  %p1714_p0 = scmp.lt.u32.totalorder %s1712_s25, %s1707_s24 }
  0x2c   : > { %p1716_p3 = scmp.lt.u32.totalorder %s1707_s24, %s2127_s10 }
  0x2d   : > { %p1710_p11 = pnand %p1709_p10, %p1708_p9  ;;  %p1715_p1 = por %p1714_p0, %p1713_p13 }
  0x2f   : > { %p1711_p12 = pneg %p1710_p11  ;;  %p1717_p7 = por %p1716_p3, %p1715_p1 }
  0x31   : > { %p1718_p5 = pnand %p1717_p7, %p1711_p12 }
  0x33   : > { %1721 = shalt.err (!%p1718_p5)
}
  0x34   : > { %s1722_s8 = scalar_lea.vmem %s2122_s26, 1024  ;;  %s1967_s9 = smov [#allocation5]  }
  0x35   : > { %p1723_p9 = scmp.ne.s32.totalorder %s2122_s26, %s1722_s8  ;;  %s1727_s11 = sshll.u32 %s1967_s9, 4  ;;  %s1728_s11 = int_to_ptr.vmem [resolvable:$false] %s1727_s11 }
  0x36   : > { %s1729_s12 = scalar_lea.vmem %s1728_s11, 2048  ;;  %p1730_p4 = scmp.lt.s32.totalorder %s2122_s26, %s1728_s11 }
  0x37   : > { %p1725_p11 = pnand %p1723_p9, %p1709_p10  ;;  %p1731_p13 = scmp.lt.s32.totalorder %s1729_s12, %s1722_s8 }
  0x39   : > { %p1726_p2 = pneg %p1725_p11  ;;  %p1732_p0 = por %p1731_p13, %p1730_p4 }
  0x3b   : > { %p1733_p1 = pnand %p1732_p0, %p1726_p2 }
  0x3d   : > { %1736 = shalt.err (!%p1733_p1)
}
  0x3e   : > { %s2657_s14 = smov 128   ;;  %s2655_s24 = smov 64  }
  0x3f   : > { %s2656_s2 = smov 4   ;;  %s2169_s20 = sadd.s32 4294967295, %s1965_s30  }
  0x40   : > { %1511 = dma.hbm_to_vmem [thread:$0]  (!%p2133_p8), %s2127_s10, 1024, %s2122_s26, %s2137_s4, %s2657_s14, %s2655_s24, %s2656_s2  }
  0x41   : > { %s1294_s25 = sadd.s32 4294967294, %s1965_s30   ;;  %p62_p2 = scmp.ne.s32.totalorder %s1933_s22, %s1929_s21 }
  0x42   : > { %p2658_p4 = scmp.eq.s32.totalorder %s2169_s20, 0  ;;  %p109_p5 = scmp.ne.s32.totalorder %s1921_s19, %s1917_s18 }
  0x43   : > { %s148_s5 = sadd.s32 1, %s1913_s17  ;;  %p158_p10 = scmp.ne.s32.totalorder %s1913_s17, %s1909_s16 }
  0x44   : > { %p2182_p12 = por %p2658_p4, %p62_p2  ;;  %p2188_p8 = por %p109_p5, %p2658_p4 }
  0x45   : > { %s2195_s10 = scalar_select %p146_p6, %s1913_s17, %s148_s5  }
  0x46   : > { %s2681_s7 = scalar_select %p2182_p12, 1, 0 }
  0x47   : > { %s2682_s26 = scalar_select %p2188_p8, 1, 0 }
  0x48   : > { %p159_p3 = scmp.eq.s32.totalorder %s2169_s20, 7  ;;  %p164_p7 = scmp.ne.s32.totalorder %s1909_s16, %s1905_s15 }
  0x49   : > { %p165_p9 = scmp.eq.s32.totalorder %s1294_s25, 7  ;;  %p1295_p11 = scmp.ge.s32.totalorder %s1965_s30, 1 }
  0x4a   : > { %p2201_p13 = por %p159_p3, %p158_p10  ;;  %p172_p0 = scmp.lt.s32.totalorder %s1965_s30, 9 }
  0x4b   : > { %p2206_p1 = por %p165_p9, %p164_p7  ;;  %s1971_s13 = smov [#allocation8]  }
  0x4c   : > { %s2683_s18 = scalar_select %p2201_p13, 1, 0 }
  0x4d   : > { %s2684_s21 = scalar_select %p2206_p1, 1, 0 }
  0x4e   : > { %p2210_p2 = pnand %p1295_p11, %p172_p0  ;;  %s184_s8 = sshll.u32 %s1971_s13, 4  ;;  %s185_s8 = int_to_ptr.vmem [resolvable:$true] %s184_s8 }
  0x4f   : > { %s40_s11 = sadd.s32 1, %s1961_s29  ;;  %s1737_s5 = scalar_lea.hbm %s2638_s1, 4096 }
  0x50   : > { %s2685_s6 = scalar_select %p2210_p2, 1, 0 }
  0x51   : > { %p1504_p6 = pneg %p2210_p2  ;;  %p1738_p10 = scmp.ne.s32.totalorder %s2638_s1, %s1737_s5 }
  0x52   : > { %p1744_p11 = scmp.lt.u32.totalorder %s1737_s5, %s2638_s1 }
  0x53   : > { %p2218_p5 = pnand %p1504_p6, %p2658_p4 }
  0x55   : > { %p1739_p3 = pneg %p2218_p5 }
  0x57   : > { %p1740_p7 = pnand %p1739_p3, %p1738_p10 }
  0x59   : > { %p1741_p9 = pneg %p1740_p7 }
  0x5b   : > { %p1746_p0 = pnand %p1744_p11, %p1741_p9 }
  0x5d   : > { %1749 = shalt.err (!%p1746_p0)
}
  0x5e   : > { %s1750_s0 = scalar_lea.vmem %s185_s8, 4096  ;;  %p1758_p13 = scmp.lt.s32.totalorder %s185_s8, %s185_s8 }
  0x5f   : > { %p1751_p6 = scmp.ne.s32.totalorder %s185_s8, %s1750_s0  ;;  %p1759_p8 = scmp.lt.s32.totalorder %s1750_s0, %s1750_s0 }
  0x61   : > { %p1753_p4 = pnand %p1751_p6, %p1739_p3  ;;  %p1760_p12 = por %p1759_p8, %p1758_p13 }
  0x63   : > { %p1754_p1 = pneg %p1753_p4 }
  0x65   : > { %p1761_p2 = pnand %p1760_p12, %p1754_p1 }
  0x67   : > { %1764 = shalt.err (!%p1761_p2)
}
  0x68   : > { %s1972_s24 = smov 8   ;;  %s2687_s2 = smov 128  }
  0x69   : > { %s2688_s14 = sld [smem:[#allocation23_spill]]  ;;  %p2691_p13 = scmp.eq.s32.totalorder %s1965_s30, 0 }
  0x6a   : > { %s2689_s5 = sld [smem:[#allocation16_spill]]  ;;  %s1340_s13 = sshll.u32 %s1961_s29, 10 }
  0x6b   : > { %1507 = dma.hbm_to_vmem [thread:$0]  (!%p2218_p5), %s2638_s1, 4096, %s185_s8, [#allocation9], %s2687_s2, %s2687_s2, %s1972_s24  }
  0x6c   : > { %s2692_s2 = sld [smem:[#allocation26_spill]]  ;;  %p2693_p5 = scmp.lt.s32.totalorder %s1965_s30, 8 }
  0x6f   : > { %p2690_p4 = scmp.ge.s32.totalorder %s2688_s14, 2 }
  0x70   : > { %p103_p12 = scmp.ne.s32.totalorder %s2689_s5, %s1921_s19  ;;  %s223_s0 = sand.u32 1, %s2689_s5  }
  0x71   : > { %s2741_s11 = smov (!%p2690_p4, %s40_s11), %s1961_s29  ;;  %s1302_s9 = sshll.u32 %s223_s0, 6 }
  0x72   : > { %p42_p8 = scmp.ge.s32.totalorder %s2741_s11, 2  ;;  %p105_p1 = por %p103_p12, %p2691_p13 }
  0x73   : > { %s225_s12 = scalar_lea.vmem [#allocation10], %s1302_s9  ;;  %s96_s27 = sadd.s32 1, %s2689_s5 }
  0x74   : > { %s2743_s11 = smov (%p42_p8, %s2741_s11), 0  ;;  %s232_s25 = sshll.u32 %s225_s12, 4  ;;  %s2260_s25 = int_to_ptr.vmem [resolvable:$true] %s232_s25 }
  0x75   : > { %s93_s28 = ssub.s32 %s1961_s29, %s2743_s11  ;;  %s2258_s14 = scalar_lea.hbm %s2692_s2, %s1340_s13 }
  0x76   : > { %p94_p2 = scmp.eq.s32.totalorder %s93_s28, 0  ;;  %p2264_p10 = pnand %p2693_p5, %p105_p1 }
  0x77   : > { %s1765_s28 = scalar_lea.hbm %s2258_s14, 1024  ;;  %s1770_s12 = scalar_lea.hbm %s2692_s2, 2048 }
  0x78   : > { %s2745_s5 = smov (!%p94_p2, %s2689_s5), %s96_s27  ;;  %p1766_p3 = scmp.ne.s32.totalorder %s2258_s14, %s1765_s28 }
  0x79   : > { %p1767_p7 = pneg %p2264_p10  ;;  %p1771_p0 = scmp.lt.u32.totalorder %s2258_s14, %s2692_s2 }
  0x7a   : > { %p1772_p6 = scmp.lt.u32.totalorder %s1770_s12, %s1765_s28  ;;  %p1774_p12 = scmp.lt.u32.totalorder %s1765_s28, %s2258_s14 }
  0x7b   : > { %p1768_p9 = pnand %p1767_p7, %p1766_p3 }
  0x7c   : > { %p1773_p4 = por %p1772_p6, %p1771_p0 }
  0x7d   : > { %p1769_p11 = pneg %p1768_p9 }
  0x7e   : > { %p1775_p8 = por %p1774_p12, %p1773_p4 }
  0x80   : > { %p1776_p13 = pnand %p1775_p8, %p1769_p11 }
  0x82   : > { %1779 = shalt.err (!%p1776_p13)
}
  0x83   : > { %s1780_s27 = scalar_lea.vmem %s2260_s25, 1024  ;;  %s1973_s9 = smov [#allocation10]  }
  0x84   : > { %p1781_p1 = scmp.ne.s32.totalorder %s2260_s25, %s1780_s27  ;;  %s1785_s13 = sshll.u32 %s1973_s9, 4  ;;  %s1786_s13 = int_to_ptr.vmem [resolvable:$false] %s1785_s13 }
  0x85   : > { %s1787_s8 = scalar_lea.vmem %s1786_s13, 2048  ;;  %p1788_p3 = scmp.lt.s32.totalorder %s2260_s25, %s1786_s13 }
  0x86   : > { %p1783_p2 = pnand %p1781_p1, %p1767_p7  ;;  %p1789_p9 = scmp.lt.s32.totalorder %s1787_s8, %s1780_s27 }
  0x88   : > { %p1784_p5 = pneg %p1783_p2  ;;  %p1790_p0 = por %p1789_p9, %p1788_p3 }
  0x8a   : > { %p1791_p6 = pnand %p1790_p0, %p1784_p5 }
  0x8c   : > { %1794 = shalt.err (!%p1791_p6)
}
  0x8d   : > { %s2695_s28 = smov 4   ;;  %s2696_s12 = smov 64  }
  0x8e   : > { %1514 = dma.hbm_to_vmem [thread:$0]  (!%p2264_p10), %s2258_s14, 1024, %s2260_s25, %s2137_s4, %s2696_s12, %s2696_s12, %s2695_s28  }
  0x8f   : > { %p2697_p7 = scmp.ne.s32.totalorder %s2685_s6, 0 }
  0x90   : > { %s252_s24 = sand.u32 (!%p2697_p7), 1, %s2169_s20   ;;  %s254_s27 = sand.u32 (!%p2697_p7), 1, %s1933_s22  }
  0x91   : > { %250 = sbr.rel (%p2697_p7) target bundleno = 987 (0x3db), region = 36  ;;  %s1306_s9 = sshll.u32 (!%p2697_p7), %s254_s27, 6 }
  0x92   : > { %s253_s13 = scalar_lea.sflag (!%p2697_p7), [#allocation6], %s252_s24  ;;  %s2304_s8 = scalar_lea.vmem (!%p2697_p7), [#allocation5], %s1306_s9 }
  0x93   : > { %p2698_p11 = scmp.ne.s32.totalorder (!%p2697_p7), %s2681_s7, 0 }
  0x98   : > { %1888 = dma.done.wait (%p2698_p11), %s253_s13, 1024  }
  0x99   : > { %1890 = vsyncadd (%p2698_p11), %s253_s13, 4294966272  ;;  %p2699_p4 = scmp.eq.s32.totalorder %s2169_s20, 0 }
  0x9b   : > { %1892 = dma.done.wait (%p2699_p4), [#allocation9], 4096   ;;  %p2700_p10 = pmov %p2699_p4 }
  0x9c   : > { %s267_s4 = sand.u32 1, %s1921_s19   ;;  %p2701_p12 = scmp.ne.s32.totalorder %s2682_s26, 0 }
  0x9d   : > { %1894 = vsyncadd (%p2700_p10), [#allocation9], 4294963200  ;;  %s1308_s6 = sshll.u32 %s267_s4, 6 }
  0x9e   : > { %s2315_s25 = scalar_lea.vmem [#allocation10], %s1308_s6 }
  0x9f   : > { %1896 = dma.done.wait (%p2701_p12), %s253_s13, 1024  }
  0xa0   : > { %1898 = vsyncadd (%p2701_p12), %s253_s13, 4294966272  ;;  %s2702_s7 = sld [smem:[#allocation19_spill]]  ;;  %s2703_s14 = sld [smem:[#allocation18_spill]] }
  0xa1   : > { %s2704_s20 = sld [smem:[#allocation17_spill]]  ;;  %s299_s0 = sand.u32 1, %s1909_s16  }
  0xa2   : > { %s1309_s28 = sshll.u32 %s299_s0, 7  ;;  %s2705_s24 = sld [smem:[#allocation27_spill]] }
  0xa3   : > { %s2339_s9 = scalar_lea.vmem [#allocation11], %s1309_s28 }
  0xa6   : > { %p303_p8 = scmp.lt.s32.totalorder %s2702_s7, 1  ;;  %p308_p13 = scmp.eq.s32.totalorder %s2702_s7, 0 }
  0xa7   : > { %p309_p1 = scmp.eq.s32.totalorder %s2703_s14, 0  ;;  %p312_p5 = scmp.eq.s32.totalorder %s2704_s20, 0 }
  0xa8   : > { %s2747_s7 = smov (!%p303_p8, %s2702_s7), 1 }
  0xa9   : > { %p310_p2 = pnand %p309_p1, %p308_p13  ;;  %s305_s27 = scalar_lea.vmem %s2705_s24, %s2747_s7 }
  0xab   : > { %p311_p3 = pneg %p310_p2 }
  0xad   : > { %p313_p9 = pnand %p312_p5, %p311_p3 }
  0xae   : > { %v317_v0 = vld [vmem:[#allocation8] sm:$0xff] (!%p313_p9)  ;;  %v318_v1 = vld [vmem:[#allocation8 + $0x8] sm:$0xff] (!%p313_p9)  ;;  %v319_v2 = vld [vmem:[#allocation8 + $0x10] sm:$0xff] (!%p313_p9) }
  0xaf   : > { %316 = sbr.rel (%p313_p9) target bundleno = 191 (0xbf), region = 52  ;;  %349 = vst [vmem:[#allocation2] sm:$0xff] (!%p313_p9), %v317_v0  ;;  %350 = vst [vmem:[#allocation2 + $0x8] sm:$0xff] (!%p313_p9), %v318_v1  ;;  %v320_v3 = vld [vmem:[#allocation8 + $0x18] sm:$0xff] (!%p313_p9)  ;;  %v321_v4 = vld [vmem:[#allocation8 + $0x20] sm:$0xff] (!%p313_p9) }
  0xb0   : > { %351 = vst [vmem:[#allocation2 + $0x10] sm:$0xff] (!%p313_p9), %v319_v2  ;;  %v322_v5 = vld [vmem:[#allocation8 + $0x28] sm:$0xff] (!%p313_p9)  ;;  %352 = vst [vmem:[#allocation2 + $0x18] sm:$0xff] (!%p313_p9), %v320_v3  ;;  %v323_v6 = vld [vmem:[#allocation8 + $0x30] sm:$0xff] (!%p313_p9) }
  0xb1   : > { %353 = vst [vmem:[#allocation2 + $0x20] sm:$0xff] (!%p313_p9), %v321_v4  ;;  %354 = vst [vmem:[#allocation2 + $0x28] sm:$0xff] (!%p313_p9), %v322_v5  ;;  %v324_v7 = vld [vmem:[#allocation8 + $0x38] sm:$0xff] (!%p313_p9)  ;;  %v325_v8 = vld [vmem:[#allocation8 + $0x40] sm:$0xff] (!%p313_p9) }
  0xb2   : > { %355 = vst [vmem:[#allocation2 + $0x30] sm:$0xff] (!%p313_p9), %v323_v6  ;;  %356 = vst [vmem:[#allocation2 + $0x38] sm:$0xff] (!%p313_p9), %v324_v7  ;;  %v326_v9 = vld [vmem:[#allocation8 + $0x48] sm:$0xff] (!%p313_p9)  ;;  %v327_v10 = vld [vmem:[#allocation8 + $0x50] sm:$0xff] (!%p313_p9) }
  0xb3   : > { %357 = vst [vmem:[#allocation2 + $0x40] sm:$0xff] (!%p313_p9), %v325_v8  ;;  %v328_v11 = vld [vmem:[#allocation8 + $0x58] sm:$0xff] (!%p313_p9)  ;;  %358 = vst [vmem:[#allocation2 + $0x48] sm:$0xff] (!%p313_p9), %v326_v9  ;;  %v329_v12 = vld [vmem:[#allocation8 + $0x60] sm:$0xff] (!%p313_p9) }
  0xb4   : > { %359 = vst [vmem:[#allocation2 + $0x50] sm:$0xff] (!%p313_p9), %v327_v10  ;;  %360 = vst [vmem:[#allocation2 + $0x58] sm:$0xff] (!%p313_p9), %v328_v11  ;;  %v330_v13 = vld [vmem:[#allocation8 + $0x68] sm:$0xff] (!%p313_p9)  ;;  %v331_v14 = vld [vmem:[#allocation8 + $0x70] sm:$0xff] (!%p313_p9) }
  0xb5   : > { %361 = vst [vmem:[#allocation2 + $0x60] sm:$0xff] (!%p313_p9), %v329_v12  ;;  %362 = vst [vmem:[#allocation2 + $0x68] sm:$0xff] (!%p313_p9), %v330_v13  ;;  %v332_v15 = vld [vmem:[#allocation8 + $0x78] sm:$0xff] (!%p313_p9)  ;;  %v333_v16 = vld [vmem:[#allocation8 + $0x80] sm:$0xff] (!%p313_p9) }
  0xb6   : > { %363 = vst [vmem:[#allocation2 + $0x70] sm:$0xff] %v331_v14  ;;  %v334_v17 = vld [vmem:[#allocation8 + $0x88] sm:$0xff]  ;;  %364 = vst [vmem:[#allocation2 + $0x78] sm:$0xff] %v332_v15  ;;  %v335_v18 = vld [vmem:[#allocation8 + $0x90] sm:$0xff] }
  0xb7   : > { %365 = vst [vmem:[#allocation2 + $0x80] sm:$0xff] %v333_v16  ;;  %366 = vst [vmem:[#allocation2 + $0x88] sm:$0xff] %v334_v17  ;;  %v336_v19 = vld [vmem:[#allocation8 + $0x98] sm:$0xff]  ;;  %v337_v20 = vld [vmem:[#allocation8 + $0xa0] sm:$0xff] }
  0xb8   : > { %367 = vst [vmem:[#allocation2 + $0x90] sm:$0xff] %v335_v18  ;;  %368 = vst [vmem:[#allocation2 + $0x98] sm:$0xff] %v336_v19  ;;  %v338_v21 = vld [vmem:[#allocation8 + $0xa8] sm:$0xff]  ;;  %v339_v22 = vld [vmem:[#allocation8 + $0xb0] sm:$0xff] }
  0xb9   : > { %369 = vst [vmem:[#allocation2 + $0xa0] sm:$0xff] %v337_v20  ;;  %v340_v23 = vld [vmem:[#allocation8 + $0xb8] sm:$0xff]  ;;  %370 = vst [vmem:[#allocation2 + $0xa8] sm:$0xff] %v338_v21  ;;  %v341_v24 = vld [vmem:[#allocation8 + $0xc0] sm:$0xff] }
  0xba   : > { %371 = vst [vmem:[#allocation2 + $0xb0] sm:$0xff] %v339_v22  ;;  %372 = vst [vmem:[#allocation2 + $0xb8] sm:$0xff] %v340_v23  ;;  %v342_v25 = vld [vmem:[#allocation8 + $0xc8] sm:$0xff]  ;;  %v343_v26 = vld [vmem:[#allocation8 + $0xd0] sm:$0xff] }
  0xbb   : > { %373 = vst [vmem:[#allocation2 + $0xc0] sm:$0xff] %v341_v24  ;;  %374 = vst [vmem:[#allocation2 + $0xc8] sm:$0xff] %v342_v25  ;;  %v344_v27 = vld [vmem:[#allocation8 + $0xd8] sm:$0xff]  ;;  %v345_v28 = vld [vmem:[#allocation8 + $0xe0] sm:$0xff] }
  0xbc   : > { %375 = vst [vmem:[#allocation2 + $0xd0] sm:$0xff] %v343_v26  ;;  %v346_v29 = vld [vmem:[#allocation8 + $0xe8] sm:$0xff]  ;;  %376 = vst [vmem:[#allocation2 + $0xd8] sm:$0xff] %v344_v27  ;;  %v347_v30 = vld [vmem:[#allocation8 + $0xf0] sm:$0xff] }
  0xbd   : > { %377 = vst [vmem:[#allocation2 + $0xe0] sm:$0xff] %v345_v28  ;;  %378 = vst [vmem:[#allocation2 + $0xe8] sm:$0xff] %v346_v29  ;;  %v348_v31 = vld [vmem:[#allocation8 + $0xf8] sm:$0xff] }
  0xbe   : > { %379 = vst [vmem:[#allocation2 + $0xf0] sm:$0xff] %v347_v30  ;;  %380 = vst [vmem:[#allocation2 + $0xf8] sm:$0xff] %v348_v31 }
  0xbf PF: > { %p381_p0 = pnand %p312_p5, %p309_p1 }
  0xc0   : > { %v1659_v32 = vld [vmem:[%s2315_s25] sm:$0xff] (!%p381_p0)   ;;  %v1660_v33 = vld [vmem:[%s2315_s25 + $0x8] sm:$0xff] (!%p381_p0)   ;;  %v1661_v34 = vld [vmem:[%s2315_s25 + $0x10] sm:$0xff] (!%p381_p0)  }
  0xc1   : > { %384 = sbr.rel (%p381_p0) target bundleno = 467 (0x1d3), region = 56  ;;  %1382 = vmatprep.subr.bf16.mxu0 (!%p381_p0), %v1659_v32  ;;  %1462 = vmatprep.subr.bf16.mxu1 (!%p381_p0), %v1659_v32  ;;  %v1662_v35 = vld [vmem:[%s2315_s25 + $0x18] sm:$0xff] (!%p381_p0)   ;;  %v385_v36 = vld [vmem:[#allocation2] sm:$0xff] (!%p381_p0)  ;;  %v386_v37 = vld [vmem:[#allocation2 + $0x8] sm:$0xff] (!%p381_p0) }
  0xc2   : > { %1383 = vmatpush3.bf16.msra.mxu0 (!%p381_p0), %v1659_v32  ;;  %1470 = vmatpush3.bf16.msra.mxu1 (!%p381_p0), %v1659_v32  ;;  %v401_v38 = vld [vmem:[#allocation2 + $0x80] sm:$0xff] (!%p381_p0)  ;;  %v417_v39 = vpack.c.bf16 (!%p381_p0), %v386_v37, %v385_v36  ;;  %v402_v40 = vld [vmem:[#allocation2 + $0x88] sm:$0xff] (!%p381_p0)  ;;  %v1665_v44 = vld [vmem:[%s2315_s25 + $0x30] sm:$0xff] (!%p381_p0)  }
  0xc3   : > { %1384 = vmatprep.subr.bf16.mxu0 (!%p381_p0), %v1660_v33  ;;  %1463 = vmatprep.subr.bf16.mxu1 (!%p381_p0), %v1660_v33  ;;  %v425_v41 = vpack.c.bf16 (!%p381_p0), %v402_v40, %v401_v38  ;;  %v1663_v42 = vld [vmem:[%s2315_s25 + $0x20] sm:$0xff] (!%p381_p0)   ;;  %v1664_v43 = vld [vmem:[%s2315_s25 + $0x28] sm:$0xff] (!%p381_p0)   ;;  %v1666_v45 = vld [vmem:[%s2315_s25 + $0x38] sm:$0xff] (!%p381_p0)  }
  0xc4   : > { %1398 = vmatprep.mubr.bf16.mxu0 (!%p381_p0), %v417_v39  ;;  %v387_v46 = vld [vmem:[#allocation2 + $0x10] sm:$0xff] (!%p381_p0)  ;;  %v388_v47 = vld [vmem:[#allocation2 + $0x18] sm:$0xff] (!%p381_p0)  ;;  %v389_v50 = vld [vmem:[#allocation2 + $0x20] sm:$0xff] (!%p381_p0) }
  0xc5   : > { %1414 = vmatprep.mubr.bf16.mxu1 (!%p381_p0), %v425_v41  ;;  %v403_v48 = vld [vmem:[#allocation2 + $0x90] sm:$0xff] (!%p381_p0)  ;;  %v404_v49 = vld [vmem:[#allocation2 + $0x98] sm:$0xff] (!%p381_p0)  ;;  %v390_v51 = vld [vmem:[#allocation2 + $0x28] sm:$0xff] (!%p381_p0)  ;;  %v418_v54 = vpack.c.bf16 (!%p381_p0), %v388_v47, %v387_v46 }
  0xc6   : > { %1385 = vmatpush3.bf16.msra.mxu0 (!%p381_p0), %v1660_v33  ;;  %1471 = vmatpush3.bf16.msra.mxu1 (!%p381_p0), %v1660_v33  ;;  %v405_v52 = vld [vmem:[#allocation2 + $0xa0] sm:$0xff] (!%p381_p0)  ;;  %v406_v53 = vld [vmem:[#allocation2 + $0xa8] sm:$0xff] (!%p381_p0)  ;;  %v426_v55 = vpack.c.bf16 (!%p381_p0), %v404_v49, %v403_v48  ;;  %v419_v56 = vpack.c.bf16 (!%p381_p0), %v390_v51, %v389_v50  ;;  %v391_v58 = vld [vmem:[#allocation2 + $0x30] sm:$0xff] (!%p381_p0) }
  0xc7   : > { %1386 = vmatprep.subr.bf16.mxu0 (!%p381_p0), %v1661_v34  ;;  %1464 = vmatprep.subr.bf16.mxu1 (!%p381_p0), %v1661_v34  ;;  %v427_v57 = vpack.c.bf16 (!%p381_p0), %v406_v53, %v405_v52  ;;  %v392_v59 = vld [vmem:[#allocation2 + $0x38] sm:$0xff] (!%p381_p0)  ;;  %v407_v60 = vld [vmem:[#allocation2 + $0xb0] sm:$0xff] (!%p381_p0)  ;;  %v393_v62 = vld [vmem:[#allocation2 + $0x40] sm:$0xff] (!%p381_p0) }
  0xc8   : > { %v408_v61 = vld [vmem:[#allocation2 + $0xb8] sm:$0xff]  ;;  %v394_v63 = vld [vmem:[#allocation2 + $0x48] sm:$0xff]  ;;  %v409_v0 = vld [vmem:[#allocation2 + $0xc0] sm:$0xff]  ;;  %v420_v2 = vpack.c.bf16 %v392_v59, %v391_v58 }
  0xc9   : > { %v410_v1 = vld [vmem:[#allocation2 + $0xc8] sm:$0xff]  ;;  %v428_v3 = vpack.c.bf16 %v408_v61, %v407_v60  ;;  %v421_v4 = vpack.c.bf16 %v394_v63, %v393_v62  ;;  %v395_v6 = vld [vmem:[#allocation2 + $0x50] sm:$0xff]  ;;  %v396_v7 = vld [vmem:[#allocation2 + $0x58] sm:$0xff] }
  0xca   : > { %1387 = vmatpush3.bf16.msra.mxu0 %v1661_v34  ;;  %1472 = vmatpush3.bf16.msra.mxu1 %v1661_v34  ;;  %v429_v5 = vpack.c.bf16 %v410_v1, %v409_v0  ;;  %v411_v8 = vld [vmem:[#allocation2 + $0xd0] sm:$0xff]  ;;  %v412_v9 = vld [vmem:[#allocation2 + $0xd8] sm:$0xff]  ;;  %v397_v10 = vld [vmem:[#allocation2 + $0x60] sm:$0xff]  ;;  %v422_v14 = vpack.c.bf16 %v396_v7, %v395_v6 }
  0xcb   : > { %1388 = vmatprep.subr.bf16.mxu0 %v1662_v35  ;;  %1465 = vmatprep.subr.bf16.mxu1 %v1662_v35  ;;  %v398_v11 = vld [vmem:[#allocation2 + $0x68] sm:$0xff]  ;;  %v413_v12 = vld [vmem:[#allocation2 + $0xe0] sm:$0xff]  ;;  %v430_v15 = vpack.c.bf16 %v412_v9, %v411_v8  ;;  %v399_v18 = vld [vmem:[#allocation2 + $0x70] sm:$0xff] }
  0xcc   : > { %v414_v13 = vld [vmem:[#allocation2 + $0xe8] sm:$0xff]  ;;  %v423_v16 = vpack.c.bf16 %v398_v11, %v397_v10  ;;  %v400_v19 = vld [vmem:[#allocation2 + $0x78] sm:$0xff]  ;;  %v415_v20 = vld [vmem:[#allocation2 + $0xf0] sm:$0xff] }
  0xcd   : > { %v431_v17 = vpack.c.bf16 %v414_v13, %v413_v12  ;;  %v416_v21 = vld [vmem:[#allocation2 + $0xf8] sm:$0xff]  ;;  %v424_v22 = vpack.c.bf16 %v400_v19, %v399_v18 }
  0xce   : > { %1389 = vmatpush3.bf16.msra.mxu0 %v1662_v35  ;;  %1473 = vmatpush3.bf16.msra.mxu1 %v1662_v35  ;;  %v432_v23 = vpack.c.bf16 %v416_v21, %v415_v20 }
  0xcf   : > { %1390 = vmatprep.subr.bf16.mxu0 %v1663_v42  ;;  %1466 = vmatprep.subr.bf16.mxu1 %v1663_v42 }
  0xd2   : > { %1391 = vmatpush3.bf16.msra.mxu0 %v1663_v42  ;;  %1474 = vmatpush3.bf16.msra.mxu1 %v1663_v42 }
  0xd3   : > { %1392 = vmatprep.subr.bf16.mxu0 %v1664_v43  ;;  %1467 = vmatprep.subr.bf16.mxu1 %v1664_v43 }
  0xd6   : > { %1393 = vmatpush3.bf16.msra.mxu0 %v1664_v43  ;;  %1475 = vmatpush3.bf16.msra.mxu1 %v1664_v43 }
  0xd7   : > { %1394 = vmatprep.subr.bf16.mxu0 %v1665_v44  ;;  %1468 = vmatprep.subr.bf16.mxu1 %v1665_v44 }
  0xda   : > { %1395 = vmatpush3.bf16.msra.mxu0 %v1665_v44  ;;  %1476 = vmatpush3.bf16.msra.mxu1 %v1665_v44 }
  0xdb   : > { %1396 = vmatprep.subr.bf16.mxu0 %v1666_v45  ;;  %1469 = vmatprep.subr.bf16.mxu1 %v1666_v45 }
  0xde   : > { %1397 = vmatpush3.bf16.msra.mxu0 %v1666_v45  ;;  %1477 = vmatpush3.bf16.msra.mxu1 %v1666_v45 }
  0xe1   : > { %1399 = vmatmul.mubr.bf16.vlgmr.msra.gmra.mrb[0].mxu0 %v418_v54  ;;  %1415 = vmatmul.mubr.bf16.vlgmr.msra.gmra.mrb[0].mxu1 %v426_v55 }
  0xe2   : > { %1402 = vmatprep.mubr.bf16.mxu0 %v419_v56  ;;  %1418 = vmatprep.mubr.bf16.mxu1 %v427_v57 }
  0xe9   : > { %1403 = vmatmul.mubr.bf16.gmra.mrb[4].mxu0 %v420_v2  ;;  %1419 = vmatmul.mubr.bf16.gmra.mrb[4].mxu1 %v428_v3 }
  0xea   : > { %1406 = vmatprep.mubr.bf16.mxu0 %v421_v4  ;;  %1422 = vmatprep.mubr.bf16.mxu1 %v429_v5 }
  0xf1   : > { %1407 = vmatmul.mubr.bf16.gmra.mrb[8].mxu0 %v422_v14  ;;  %1423 = vmatmul.mubr.bf16.gmra.mrb[8].mxu1 %v430_v15 }
  0xf2   : > { %1410 = vmatprep.mubr.bf16.mxu0 %v423_v16  ;;  %1426 = vmatprep.mubr.bf16.mxu1 %v431_v17 }
  0xf9   : > { %1411 = vmatmul.mubr.bf16.gmra.mrb[12].mxu0 %v424_v22  ;;  %1427 = vmatmul.mubr.bf16.gmra.mrb[12].mxu1 %v432_v23 }
 0x1b4   : > { %v1400_v24 = vpop.f32.mrb[0].mxu0  ;;  %v1416_v25 = vpop.f32.mrb[0].mxu1 }
 0x1b5   : > { %v531_v26 = vpop.f32.mrb[1].mxu0  ;;  %v595_v27 = vpop.f32.mrb[1].mxu1 }
 0x1b6   : > { %v1401_v28 = vpop.f32.mrb[2].mxu0  ;;  %v1417_v29 = vpop.f32.mrb[2].mxu1 }
 0x1b7   : > { %v659_v30 = vpack.c.bf16 %v1401_v28, %v1400_v24  ;;  %v667_v31 = vpack.c.bf16 %v1417_v29, %v1416_v25  ;;  %v534_v32 = vpop.f32.mrb[3].mxu0  ;;  %v598_v33 = vpop.f32.mrb[3].mxu1 }
 0x1b8   : > { %v658_v34 = vpack.c.bf16 %v534_v32, %v531_v26  ;;  %v666_v35 = vpack.c.bf16 %v598_v33, %v595_v27 }
 0x1b9   : > { %675 = vst [vmem:[#allocation3 + $0x8] sm:$0xff] %v659_v30  ;;  %683 = vst [vmem:[#allocation3 + $0x48] sm:$0xff] %v667_v31 }
 0x1ba   : > { %674 = vst [vmem:[#allocation3] sm:$0xff] %v658_v34  ;;  %682 = vst [vmem:[#allocation3 + $0x40] sm:$0xff] %v666_v35 }
 0x1bc   : > { %v1404_v36 = vpop.f32.mrb[4].mxu0  ;;  %v1420_v37 = vpop.f32.mrb[4].mxu1 }
 0x1bd   : > { %v547_v38 = vpop.f32.mrb[5].mxu0  ;;  %v611_v39 = vpop.f32.mrb[5].mxu1 }
 0x1be   : > { %v1405_v40 = vpop.f32.mrb[6].mxu0  ;;  %v1421_v41 = vpop.f32.mrb[6].mxu1 }
 0x1bf   : > { %v661_v42 = vpack.c.bf16 %v1405_v40, %v1404_v36  ;;  %v669_v43 = vpack.c.bf16 %v1421_v41, %v1420_v37  ;;  %v550_v44 = vpop.f32.mrb[7].mxu0  ;;  %v614_v45 = vpop.f32.mrb[7].mxu1 }
 0x1c0   : > { %v660_v46 = vpack.c.bf16 %v550_v44, %v547_v38  ;;  %v668_v47 = vpack.c.bf16 %v614_v45, %v611_v39 }
 0x1c1   : > { %677 = vst [vmem:[#allocation3 + $0x18] sm:$0xff] %v661_v42  ;;  %685 = vst [vmem:[#allocation3 + $0x58] sm:$0xff] %v669_v43 }
 0x1c2   : > { %676 = vst [vmem:[#allocation3 + $0x10] sm:$0xff] %v660_v46  ;;  %684 = vst [vmem:[#allocation3 + $0x50] sm:$0xff] %v668_v47 }
 0x1c4   : > { %v1408_v48 = vpop.f32.mrb[8].mxu0  ;;  %v1424_v49 = vpop.f32.mrb[8].mxu1 }
 0x1c5   : > { %v563_v50 = vpop.f32.mrb[9].mxu0  ;;  %v627_v51 = vpop.f32.mrb[9].mxu1 }
 0x1c6   : > { %v1409_v52 = vpop.f32.mrb[10].mxu0  ;;  %v1425_v53 = vpop.f32.mrb[10].mxu1 }
 0x1c7   : > { %v663_v54 = vpack.c.bf16 %v1409_v52, %v1408_v48  ;;  %v671_v55 = vpack.c.bf16 %v1425_v53, %v1424_v49  ;;  %v566_v56 = vpop.f32.mrb[11].mxu0  ;;  %v630_v57 = vpop.f32.mrb[11].mxu1 }
 0x1c8   : > { %v662_v58 = vpack.c.bf16 %v566_v56, %v563_v50  ;;  %v670_v59 = vpack.c.bf16 %v630_v57, %v627_v51 }
 0x1c9   : > { %679 = vst [vmem:[#allocation3 + $0x28] sm:$0xff] %v663_v54  ;;  %687 = vst [vmem:[#allocation3 + $0x68] sm:$0xff] %v671_v55 }
 0x1ca   : > { %678 = vst [vmem:[#allocation3 + $0x20] sm:$0xff] %v662_v58  ;;  %686 = vst [vmem:[#allocation3 + $0x60] sm:$0xff] %v670_v59 }
 0x1cc   : > { %v1412_v60 = vpop.f32.mrb[12].mxu0  ;;  %v1428_v61 = vpop.f32.mrb[12].mxu1 }
 0x1cd   : > { %v579_v62 = vpop.f32.mrb[13].mxu0  ;;  %v643_v63 = vpop.f32.mrb[13].mxu1 }
 0x1ce   : > { %v1413_v0 = vpop.f32.mrb[14].mxu0  ;;  %v1429_v1 = vpop.f32.mrb[14].mxu1 }
 0x1cf   : > { %v665_v2 = vpack.c.bf16 %v1413_v0, %v1412_v60  ;;  %v673_v3 = vpack.c.bf16 %v1429_v1, %v1428_v61  ;;  %v582_v4 = vpop.f32.mrb[15].mxu0  ;;  %v646_v5 = vpop.f32.mrb[15].mxu1 }
 0x1d0   : > { %v664_v6 = vpack.c.bf16 %v582_v4, %v579_v62  ;;  %v672_v7 = vpack.c.bf16 %v646_v5, %v643_v63 }
 0x1d1   : > { %681 = vst [vmem:[#allocation3 + $0x38] sm:$0xff] %v665_v2  ;;  %689 = vst [vmem:[#allocation3 + $0x78] sm:$0xff] %v673_v3 }
 0x1d2   : > { %680 = vst [vmem:[#allocation3 + $0x30] sm:$0xff] %v664_v6  ;;  %688 = vst [vmem:[#allocation3 + $0x70] sm:$0xff] %v672_v7 }
 0x1d3 PF: > { %s2708_s6 = sld [smem:[#allocation17_spill]] }
 0x1d9   : > { %p1318_p6 = scmp.ne.s32.totalorder %s2708_s6, 0 }
 0x1da   : > { %v1974_v8 = vmov (!%p1318_p6), 0.0  }
 0x1db   : > { %692 = sbr.rel (%p1318_p6) target bundleno = 483 (0x1e3), region = 60  ;;  %693 = vst [vmem:[#allocation4] sm:$0xff] (!%p1318_p6), %v1974_v8  ;;  %694 = vst [vmem:[#allocation4 + $0x8] sm:$0xff] (!%p1318_p6), %v1974_v8 }
 0x1dc   : > { %695 = vst [vmem:[#allocation4 + $0x10] sm:$0xff] (!%p1318_p6), %v1974_v8  ;;  %696 = vst [vmem:[#allocation4 + $0x18] sm:$0xff] (!%p1318_p6), %v1974_v8 }
 0x1dd   : > { %697 = vst [vmem:[#allocation4 + $0x20] sm:$0xff] (!%p1318_p6), %v1974_v8  ;;  %698 = vst [vmem:[#allocation4 + $0x28] sm:$0xff] (!%p1318_p6), %v1974_v8 }
 0x1de   : > { %699 = vst [vmem:[#allocation4 + $0x30] sm:$0xff] (!%p1318_p6), %v1974_v8  ;;  %700 = vst [vmem:[#allocation4 + $0x38] sm:$0xff] (!%p1318_p6), %v1974_v8 }
 0x1df   : > { %701 = vst [vmem:[#allocation4 + $0x40] sm:$0xff] (!%p1318_p6), %v1974_v8  ;;  %702 = vst [vmem:[#allocation4 + $0x48] sm:$0xff] (!%p1318_p6), %v1974_v8 }
 0x1e0   : > { %703 = vst [vmem:[#allocation4 + $0x50] sm:$0xff] (!%p1318_p6), %v1974_v8  ;;  %704 = vst [vmem:[#allocation4 + $0x58] sm:$0xff] (!%p1318_p6), %v1974_v8 }
 0x1e1   : > { %705 = vst [vmem:[#allocation4 + $0x60] sm:$0xff] (!%p1318_p6), %v1974_v8  ;;  %706 = vst [vmem:[#allocation4 + $0x68] sm:$0xff] (!%p1318_p6), %v1974_v8 }
 0x1e2   : > { %707 = vst [vmem:[#allocation4 + $0x70] sm:$0xff] %v1974_v8  ;;  %708 = vst [vmem:[#allocation4 + $0x78] sm:$0xff] %v1974_v8 }
 0x1e3 PF: > { %s2709_s25 = sld [smem:[#allocation17_spill]]  ;;  %v1667_v9 = vld [vmem:[%s2304_s8] sm:$0xff]   ;;  %v1669_v19 = vld [vmem:[%s2304_s8 + $0x8] sm:$0xff]   ;;  %v1671_v21 = vld [vmem:[%s2304_s8 + $0x10] sm:$0xff]  }
 0x1e4   : > { %v1668_v10 = vld [vmem:[%s2304_s8 + $0x20] sm:$0xff]   ;;  %1446 = vmatprep.mubr.bf16.mxu0 %v1667_v9  ;;  %v1670_v20 = vld [vmem:[%s2304_s8 + $0x28] sm:$0xff]   ;;  %v1672_v22 = vld [vmem:[%s2304_s8 + $0x30] sm:$0xff]  }
 0x1e5   : > { %1454 = vmatprep.mubr.bf16.mxu1 %v1668_v10  ;;  %v1673_v23 = vld [vmem:[%s2304_s8 + $0x18] sm:$0xff]   ;;  %v712_v25 = vld [vmem:[#allocation4 + $0x10] sm:$0xff]  ;;  %v710_v27 = vld [vmem:[#allocation4] sm:$0xff] }
 0x1e6   : > { %v1674_v24 = vld [vmem:[%s2304_s8 + $0x38] sm:$0xff]   ;;  %v711_v37 = vld [vmem:[#allocation4 + $0x8] sm:$0xff]  ;;  %v716_v49 = vld [vmem:[#allocation4 + $0x30] sm:$0xff] }
 0x1e7   : > { %v718_v28 = vld [vmem:[#allocation4 + $0x40] sm:$0xff]  ;;  %v713_v31 = vld [vmem:[#allocation4 + $0x18] sm:$0xff]  ;;  %v719_v38 = vld [vmem:[#allocation4 + $0x48] sm:$0xff] }
 0x1e8   : > { %v720_v26 = vld [vmem:[#allocation4 + $0x50] sm:$0xff]  ;;  %v721_v32 = vld [vmem:[#allocation4 + $0x58] sm:$0xff]  ;;  %v714_v51 = vld [vmem:[#allocation4 + $0x20] sm:$0xff] }
 0x1e9   : > { %s1319_s14 = sshll.u32 %s2709_s25, 7  ;;  %v724_v50 = vld [vmem:[#allocation4 + $0x70] sm:$0xff]  ;;  %v722_v52 = vld [vmem:[#allocation4 + $0x60] sm:$0xff]  ;;  %v717_v55 = vld [vmem:[#allocation4 + $0x38] sm:$0xff]  ;;  %p1329_p7 = scmp.ne.s32.totalorder %s2709_s25, 1 }
 0x1ea   : > { %s742_s20 = sshra.s32 %s1319_s14, 4  ;;  %v725_v56 = vld [vmem:[#allocation4 + $0x78] sm:$0xff]  ;;  %v715_v61 = vld [vmem:[#allocation4 + $0x28] sm:$0xff]  ;;  %s2711_s13 = sld [smem:[#allocation18_spill]] (!%p1329_p7)  ;;  %v1330_v10 = vld [vmem:[%s305_s27] ss:$0 sm:$0xff] (!%p1329_p7) }
 0x1eb   : > { %s1320_s28 = sshll.u32 %s742_s20, 3  ;;  %v723_v62 = vld [vmem:[#allocation4 + $0x68] sm:$0xff]  ;;  %s2712_s27 = sld [smem:[#allocation19_spill]] (!%p1329_p7) }
 0x1ec   : > { %s2357_s26 = scalar_lea.vmem [#allocation3], %s1320_s28 }
 0x1ed   : > { %v746_v11 = vld [vmem:[%s2357_s26] sm:$0xff]  ;;  %v747_v12 = vld [vmem:[%s2357_s26 + $0x8] sm:$0xff]  ;;  %v748_v13 = vld [vmem:[%s2357_s26 + $0x10] sm:$0xff] }
 0x1ee   : > { %1430 = vmatprep.subr.bf16.mxu0 %v746_v11  ;;  %1478 = vmatprep.subr.bf16.mxu1 %v746_v11  ;;  %v749_v14 = vld [vmem:[%s2357_s26 + $0x18] sm:$0xff]  ;;  %v750_v15 = vld [vmem:[%s2357_s26 + $0x20] sm:$0xff]  ;;  %v751_v16 = vld [vmem:[%s2357_s26 + $0x28] sm:$0xff] }
 0x1ef   : > { %1431 = vmatpush3.bf16.msra.mxu0 %v746_v11  ;;  %1486 = vmatpush3.bf16.msra.mxu1 %v746_v11  ;;  %v752_v17 = vld [vmem:[%s2357_s26 + $0x30] sm:$0xff]  ;;  %v753_v18 = vld [vmem:[%s2357_s26 + $0x38] sm:$0xff] }
 0x1f0   : > { %1432 = vmatprep.subr.bf16.mxu0 %v747_v12  ;;  %1479 = vmatprep.subr.bf16.mxu1 %v747_v12  ;;  %s1331_s4 = sshll.u32 (!%p1329_p7), %s2711_s13, 7 }
 0x1f1   : > { %s2390_s7 = scalar_lea.vmem (!%p1329_p7), [#allocation2], %s1331_s4  ;;  %p1332_p11 = scmp.ne.s32.totalorder (!%p1329_p7), %s2712_s27, 1 }
 0x1f3   : > { %1433 = vmatpush3.bf16.msra.mxu0 %v747_v12  ;;  %1487 = vmatpush3.bf16.msra.mxu1 %v747_v12 }
 0x1f4   : > { %1434 = vmatprep.subr.bf16.mxu0 %v748_v13  ;;  %1480 = vmatprep.subr.bf16.mxu1 %v748_v13 }
 0x1f7   : > { %1435 = vmatpush3.bf16.msra.mxu0 %v748_v13  ;;  %1488 = vmatpush3.bf16.msra.mxu1 %v748_v13 }
 0x1f8   : > { %1436 = vmatprep.subr.bf16.mxu0 %v749_v14  ;;  %1481 = vmatprep.subr.bf16.mxu1 %v749_v14 }
 0x1fb   : > { %1437 = vmatpush3.bf16.msra.mxu0 %v749_v14  ;;  %1489 = vmatpush3.bf16.msra.mxu1 %v749_v14 }
 0x1fc   : > { %1438 = vmatprep.subr.bf16.mxu0 %v750_v15  ;;  %1482 = vmatprep.subr.bf16.mxu1 %v750_v15 }
 0x1ff   : > { %1439 = vmatpush3.bf16.msra.mxu0 %v750_v15  ;;  %1490 = vmatpush3.bf16.msra.mxu1 %v750_v15 }
 0x200   : > { %1440 = vmatprep.subr.bf16.mxu0 %v751_v16  ;;  %1483 = vmatprep.subr.bf16.mxu1 %v751_v16 }
 0x203   : > { %1441 = vmatpush3.bf16.msra.mxu0 %v751_v16  ;;  %1491 = vmatpush3.bf16.msra.mxu1 %v751_v16 }
 0x204   : > { %1442 = vmatprep.subr.bf16.mxu0 %v752_v17  ;;  %1484 = vmatprep.subr.bf16.mxu1 %v752_v17 }
 0x207   : > { %1443 = vmatpush3.bf16.msra.mxu0 %v752_v17  ;;  %1492 = vmatpush3.bf16.msra.mxu1 %v752_v17 }
 0x208   : > { %1444 = vmatprep.subr.bf16.mxu0 %v753_v18  ;;  %1485 = vmatprep.subr.bf16.mxu1 %v753_v18 }
 0x20b   : > { %1445 = vmatpush3.bf16.msra.mxu0 %v753_v18  ;;  %1493 = vmatpush3.bf16.msra.mxu1 %v753_v18 }
 0x20e   : > { %1447 = vmatmul.mubr.bf16.vlgmr.msra.gmra.mrb[0].mxu0 %v1669_v19  ;;  %1455 = vmatmul.mubr.bf16.vlgmr.msra.gmra.mrb[0].mxu1 %v1670_v20 }
 0x20f   : > { %1450 = vmatprep.mubr.bf16.mxu0 %v1671_v21  ;;  %1458 = vmatprep.mubr.bf16.mxu1 %v1672_v22 }
 0x216   : > { %1451 = vmatmul.mubr.bf16.gmra.mrb[4].mxu0 %v1673_v23  ;;  %1459 = vmatmul.mubr.bf16.gmra.mrb[4].mxu1 %v1674_v24 }
 0x2e1   : > { %v1448_v29 = vpop.f32.mrb[0].mxu0  ;;  %v1456_v30 = vpop.f32.mrb[0].mxu1 }
 0x2e2   : > { %v901_v33 = vadd.f32 %v1448_v29, %v712_v25  ;;  %v909_v34 = vadd.f32 %v1456_v30, %v720_v26  ;;  %v836_v35 = vpop.f32.mrb[1].mxu0  ;;  %v868_v36 = vpop.f32.mrb[1].mxu1 }
 0x2e3   : > { %v899_v39 = vadd.f32 %v836_v35, %v710_v27  ;;  %v907_v40 = vadd.f32 %v868_v36, %v718_v28  ;;  %v1449_v41 = vpop.f32.mrb[2].mxu0  ;;  %v1457_v42 = vpop.f32.mrb[2].mxu1 }
 0x2e4   : > { %917 = vst [vmem:[#allocation4 + $0x10] sm:$0xff] %v901_v33  ;;  %925 = vst [vmem:[#allocation4 + $0x50] sm:$0xff] %v909_v34  ;;  %v902_v43 = vadd.f32 %v1449_v41, %v713_v31  ;;  %v910_v44 = vadd.f32 %v1457_v42, %v721_v32  ;;  %v839_v45 = vpop.f32.mrb[3].mxu0  ;;  %v871_v46 = vpop.f32.mrb[3].mxu1 }
 0x2e5   : > { %915 = vst [vmem:[#allocation4] sm:$0xff] %v899_v39  ;;  %923 = vst [vmem:[#allocation4 + $0x40] sm:$0xff] %v907_v40  ;;  %v900_v47 = vadd.f32 %v839_v45, %v711_v37  ;;  %v908_v48 = vadd.f32 %v871_v46, %v719_v38 }
 0x2e6   : > { %918 = vst [vmem:[#allocation4 + $0x18] sm:$0xff] %v902_v43  ;;  %926 = vst [vmem:[#allocation4 + $0x58] sm:$0xff] %v910_v44 }
 0x2e7   : > { %916 = vst [vmem:[#allocation4 + $0x8] sm:$0xff] %v900_v47  ;;  %924 = vst [vmem:[#allocation4 + $0x48] sm:$0xff] %v908_v48 }
 0x2e9   : > { %v1452_v53 = vpop.f32.mrb[4].mxu0  ;;  %v1460_v54 = vpop.f32.mrb[4].mxu1  ;;  %934 = sbr.rel (%p1329_p7) target bundleno = 959 (0x3bf), region = 64 }
 0x2ea   : > { %v905_v57 = vadd.f32 %v1452_v53, %v716_v49  ;;  %v913_v58 = vadd.f32 %v1460_v54, %v724_v50  ;;  %v852_v59 = vpop.f32.mrb[5].mxu0  ;;  %v884_v60 = vpop.f32.mrb[5].mxu1 }
 0x2eb   : > { %v903_v63 = vadd.f32 %v852_v59, %v714_v51  ;;  %v911_v0 = vadd.f32 %v884_v60, %v722_v52  ;;  %v1453_v1 = vpop.f32.mrb[6].mxu0  ;;  %v1461_v2 = vpop.f32.mrb[6].mxu1  ;;  %v937_v14 = vld [vmem:[#allocation4 + $0x10] sm:$0xff] (!%p1329_p7) }
 0x2ec   : > { %921 = vst [vmem:[#allocation4 + $0x30] sm:$0xff] %v905_v57  ;;  %929 = vst [vmem:[#allocation4 + $0x70] sm:$0xff] %v913_v58  ;;  %v906_v3 = vadd.f32 %v1453_v1, %v717_v55  ;;  %v914_v4 = vadd.f32 %v1461_v2, %v725_v56  ;;  %v855_v5 = vpop.f32.mrb[7].mxu0  ;;  %v887_v6 = vpop.f32.mrb[7].mxu1  ;;  %v935_v9 = vld [vmem:[#allocation4] sm:$0xff] (!%p1329_p7)  ;;  %v960_v17 = vadd.f32 (!%p1329_p7), %v1330_v10, %v937_v14  ;;  %v945_v29 = vld [vmem:[#allocation4 + $0x50] sm:$0xff] (!%p1329_p7) }
 0x2ed   : > { %919 = vst [vmem:[#allocation4 + $0x20] sm:$0xff] %v903_v63  ;;  %927 = vst [vmem:[#allocation4 + $0x60] sm:$0xff] %v911_v0  ;;  %v904_v7 = vadd.f32 %v855_v5, %v715_v61  ;;  %v912_v8 = vadd.f32 %v887_v6, %v723_v62  ;;  %v958_v12 = vadd.f32 (!%p1329_p7), %v1330_v10, %v935_v9  ;;  %v938_v15 = vld [vmem:[#allocation4 + $0x18] sm:$0xff] (!%p1329_p7)  ;;  %v943_v27 = vld [vmem:[#allocation4 + $0x40] sm:$0xff] (!%p1329_p7) }
 0x2ee   : > { %922 = vst [vmem:[#allocation4 + $0x38] sm:$0xff] %v906_v3  ;;  %930 = vst [vmem:[#allocation4 + $0x78] sm:$0xff] %v914_v4  ;;  %v936_v11 = vld [vmem:[#allocation4 + $0x8] sm:$0xff] (!%p1329_p7)  ;;  %v961_v18 = vadd.f32 (!%p1329_p7), %v1330_v10, %v938_v15  ;;  %v2384_v30 = vmax.f32 (!%p1329_p7), %v960_v17, 0.0  ;;  %v946_v34 = vld [vmem:[#allocation4 + $0x58] sm:$0xff] (!%p1329_p7)  ;;  %v966_v39 = vadd.f32 (!%p1329_p7), %v1330_v10, %v943_v27  ;;  %v968_v44 = vadd.f32 (!%p1329_p7), %v1330_v10, %v945_v29 }
 0x2ef   : > { %920 = vst [vmem:[#allocation4 + $0x28] sm:$0xff] %v904_v7  ;;  %928 = vst [vmem:[#allocation4 + $0x68] sm:$0xff] %v912_v8  ;;  %v959_v13 = vadd.f32 (!%p1329_p7), %v1330_v10, %v936_v11  ;;  %v2380_v23 = vmax.f32 (!%p1329_p7), %v958_v12, 0.0  ;;  %v944_v28 = vld [vmem:[#allocation4 + $0x48] sm:$0xff] (!%p1329_p7)  ;;  %v969_v45 = vadd.f32 (!%p1329_p7), %v1330_v10, %v946_v34 }
 0x2f0   : > { %v2386_v31 = vmax.f32 %v961_v18, 0.0  ;;  %v967_v40 = vadd.f32 %v1330_v10, %v944_v28  ;;  %994 = vst [vmem:[%s2390_s7 + $0x10] sm:$0xff] %v2384_v30  ;;  %v2412_v47 = vmax.f32 %v966_v39, 0.0  ;;  %v2418_v51 = vmax.f32 %v968_v44, 0.0 }
 0x2f1   : > { %v2382_v24 = vmax.f32 %v959_v13, 0.0  ;;  %992 = vst [vmem:[%s2390_s7] sm:$0xff] %v2380_v23  ;;  %v2420_v52 = vmax.f32 %v969_v45, 0.0  ;;  %v1014_v58 = vmul.f32 (!%p1332_p11), %v2384_v30, %v2384_v30  ;;  %v1012_v59 = vmul.f32 (!%p1332_p11), %v2380_v23, %v2380_v23 }
 0x2f2   : > { %995 = vst [vmem:[%s2390_s7 + $0x18] sm:$0xff] %v2386_v31  ;;  %v2414_v48 = vmax.f32 %v967_v40, 0.0  ;;  %1000 = vst [vmem:[%s2390_s7 + $0x40] sm:$0xff] %v2412_v47  ;;  %v1015_v60 = vmul.f32 (!%p1332_p11), %v2386_v31, %v2386_v31  ;;  %v1020_v3 = vmul.f32 (!%p1332_p11), %v2412_v47, %v2412_v47  ;;  %v1022_v5 = vmul.f32 (!%p1332_p11), %v2418_v51, %v2418_v51 }
 0x2f3   : > { %v941_v21 = vld [vmem:[#allocation4 + $0x30] sm:$0xff]  ;;  %993 = vst [vmem:[%s2390_s7 + $0x8] sm:$0xff] %v2382_v24  ;;  %1002 = vst [vmem:[%s2390_s7 + $0x50] sm:$0xff] %v2418_v51  ;;  %1032 = vadd.xlane.f32.xlu1 (!%p1332_p11), %v1014_v58  ;;  %1028 = vadd.xlane.f32.xlu0 (!%p1332_p11), %v1012_v59  ;;  %v1013_v61 = vmul.f32 (!%p1332_p11), %v2382_v24, %v2382_v24  ;;  %v1023_v4 = vmul.f32 (!%p1332_p11), %v2420_v52, %v2420_v52 }
 0x2f4   : > { %v939_v16 = vld [vmem:[#allocation4 + $0x20] sm:$0xff]  ;;  %v964_v26 = vadd.f32 %v1330_v10, %v941_v21  ;;  %v949_v41 = vld [vmem:[#allocation4 + $0x70] sm:$0xff]  ;;  %1001 = vst [vmem:[%s2390_s7 + $0x48] sm:$0xff] %v2414_v48  ;;  %1003 = vst [vmem:[%s2390_s7 + $0x58] sm:$0xff] %v2420_v52  ;;  %v1021_v2 = vmul.f32 (!%p1332_p11), %v2414_v48, %v2414_v48 }
 0x2f5   : > { %v962_v19 = vadd.f32 %v1330_v10, %v939_v16  ;;  %v942_v22 = vld [vmem:[#allocation4 + $0x38] sm:$0xff]  ;;  %v947_v35 = vld [vmem:[#allocation4 + $0x60] sm:$0xff]  ;;  %v972_v50 = vadd.f32 %v1330_v10, %v949_v41 }
 0x2f6   : > { %v940_v20 = vld [vmem:[#allocation4 + $0x28] sm:$0xff]  ;;  %v965_v33 = vadd.f32 %v1330_v10, %v942_v22  ;;  %v2398_v38 = vmax.f32 %v964_v26, 0.0  ;;  %v950_v42 = vld [vmem:[#allocation4 + $0x78] sm:$0xff]  ;;  %v970_v46 = vadd.f32 %v1330_v10, %v947_v35  ;;  %1011 = sbr.rel (%p1332_p11) target bundleno = 944 (0x3b0), region = 68 }
 0x2f7   : > { %v963_v25 = vadd.f32 %v1330_v10, %v940_v20  ;;  %v2388_v32 = vmax.f32 %v962_v19, 0.0  ;;  %v948_v36 = vld [vmem:[#allocation4 + $0x68] sm:$0xff]  ;;  %v973_v54 = vadd.f32 %v1330_v10, %v950_v42  ;;  %v2430_v56 = vmax.f32 %v972_v50, 0.0  ;;  %1034 = vadd.xlane.f32.xlu1 (!%p1332_p11), %v1015_v60  ;;  %1030 = vadd.xlane.f32.xlu0 (!%p1332_p11), %v1013_v61 }
 0x2f8   : > { %v2406_v43 = vmax.f32 %v965_v33, 0.0  ;;  %998 = vst [vmem:[%s2390_s7 + $0x30] sm:$0xff] %v2398_v38  ;;  %v971_v49 = vadd.f32 %v1330_v10, %v948_v36  ;;  %v2422_v53 = vmax.f32 %v970_v46, 0.0  ;;  %v1018_v1 = vmul.f32 (!%p1332_p11), %v2398_v38, %v2398_v38 }
 0x2f9   : > { %v2396_v37 = vmax.f32 %v963_v25, 0.0  ;;  %996 = vst [vmem:[%s2390_s7 + $0x20] sm:$0xff] %v2388_v32  ;;  %v2438_v57 = vmax.f32 %v973_v54, 0.0  ;;  %1006 = vst [vmem:[%s2390_s7 + $0x70] sm:$0xff] %v2430_v56  ;;  %v1016_v63 = vmul.f32 (!%p1332_p11), %v2388_v32, %v2388_v32  ;;  %v1026_v9 = vmul.f32 (!%p1332_p11), %v2430_v56, %v2430_v56 }
 0x2fa   : > { %999 = vst [vmem:[%s2390_s7 + $0x38] sm:$0xff] %v2406_v43  ;;  %v2428_v55 = vmax.f32 %v971_v49, 0.0  ;;  %1004 = vst [vmem:[%s2390_s7 + $0x60] sm:$0xff] %v2422_v53  ;;  %v1019_v0 = vmul.f32 (!%p1332_p11), %v2406_v43, %v2406_v43  ;;  %v1024_v7 = vmul.f32 (!%p1332_p11), %v2422_v53, %v2422_v53 }
 0x2fb   : > { %997 = vst [vmem:[%s2390_s7 + $0x28] sm:$0xff] %v2396_v37  ;;  %1007 = vst [vmem:[%s2390_s7 + $0x78] sm:$0xff] %v2438_v57  ;;  %v1017_v62 = vmul.f32 (!%p1332_p11), %v2396_v37, %v2396_v37  ;;  %1036 = vadd.xlane.f32.xlu0 (!%p1332_p11), %v1016_v63  ;;  %v1027_v8 = vmul.f32 (!%p1332_p11), %v2438_v57, %v2438_v57 }
 0x2fc   : > { %1005 = vst [vmem:[%s2390_s7 + $0x68] sm:$0xff] %v2428_v55  ;;  %v1025_v6 = vmul.f32 (!%p1332_p11), %v2428_v55, %v2428_v55 }
 0x2fd   : > { %1038 = vadd.xlane.f32.xlu1 %v1017_v62 }
 0x2ff   : > { %1040 = vadd.xlane.f32.xlu0 %v1018_v1 }
 0x301   : > { %1042 = vadd.xlane.f32.xlu1 %v1019_v0 }
 0x303   : > { %1044 = vadd.xlane.f32.xlu0 %v1020_v3 }
 0x305   : > { %1046 = vadd.xlane.f32.xlu1 %v1021_v2 }
 0x307   : > { %1048 = vadd.xlane.f32.xlu0 %v1022_v5 }
 0x309   : > { %1050 = vadd.xlane.f32.xlu1 %v1023_v4 }
 0x30b   : > { %1052 = vadd.xlane.f32.xlu0 %v1024_v7 }
 0x30d   : > { %1054 = vadd.xlane.f32.xlu1 %v1025_v6 }
 0x30f   : > { %1056 = vadd.xlane.f32.xlu0 %v1026_v9 }
 0x311   : > { %1058 = vadd.xlane.f32.xlu1 %v1027_v8 }
 0x380   : > { %v1033_v10 = vpop.xlane.xlu1 %1032  ;;  %v1029_v11 = vpop.xlane.xlu0 %1028 }
 0x381   : > { %v1062_v12 = vmax.f32 %v1033_v10, 1e-24  ;;  %v1060_v13 = vmax.f32 %v1029_v11, 1e-24 }
 0x383   : > { %1675 = vrsqrt.f32 %v1062_v12 }
 0x384   : > { %1677 = vrsqrt.f32 %v1060_v13  ;;  %v1035_v14 = vpop.xlane.xlu1 %1034  ;;  %v1031_v15 = vpop.xlane.xlu0 %1030 }
 0x385   : > { %v1063_v16 = vmax.f32 %v1035_v14, 1e-24  ;;  %v1061_v17 = vmax.f32 %v1031_v15, 1e-24 }
 0x387   : > { %1679 = vrsqrt.f32 %v1063_v16 }
 0x388   : > { %1681 = vrsqrt.f32 %v1061_v17  ;;  %v1037_v19 = vpop.xlane.xlu0 %1036 }
 0x389   : > { %v1064_v21 = vmax.f32 %v1037_v19, 1e-24 }
 0x38a   : > { %v1039_v18 = vpop.xlane.xlu1 %1038 }
 0x38b   : > { %v1065_v20 = vmax.f32 %v1039_v18, 1e-24 }
 0x38c   : > { %v1041_v25 = vpop.xlane.xlu0 %1040 }
 0x38d   : > { %1683 = vrsqrt.f32 %v1065_v20  ;;  %v1676_v26 = vpop.eup %1675  ;;  %v1066_v28 = vmax.f32 %v1041_v25, 1e-24 }
 0x38e   : > { %1685 = vrsqrt.f32 %v1064_v21  ;;  %v1043_v22 = vpop.xlane.xlu1 %1042  ;;  %v1678_v29 = vpop.eup %1677  ;;  %v1094_v33 = vmul.f32 %v1676_v26, %v2384_v30 }
 0x38f   : > { %v1067_v27 = vmax.f32 %v1043_v22, 1e-24  ;;  %v1092_v34 = vmul.f32 %v1678_v29, %v2380_v23 }
 0x390   : > { %1110 = vst [vmem:[%s2339_s9 + $0x10] sm:$0xff] %v1094_v33  ;;  %v1045_v36 = vpop.xlane.xlu0 %1044 }
 0x391   : > { %1687 = vrsqrt.f32 %v1067_v27  ;;  %v1680_v39 = vpop.eup %1679  ;;  %1108 = vst [vmem:[%s2339_s9] sm:$0xff] %v1092_v34  ;;  %v1068_v41 = vmax.f32 %v1045_v36, 1e-24 }
 0x392   : > { %1689 = vrsqrt.f32 %v1066_v28  ;;  %v1047_v35 = vpop.xlane.xlu1 %1046  ;;  %v1682_v42 = vpop.eup %1681  ;;  %v1095_v44 = vmul.f32 %v1680_v39, %v2386_v31 }
 0x393   : > { %v1069_v40 = vmax.f32 %v1047_v35, 1e-24  ;;  %v1093_v45 = vmul.f32 %v1682_v42, %v2382_v24 }
 0x394   : > { %1111 = vst [vmem:[%s2339_s9 + $0x18] sm:$0xff] %v1095_v44  ;;  %v1049_v49 = vpop.xlane.xlu0 %1048 }
 0x395   : > { %1691 = vrsqrt.f32 %v1069_v40  ;;  %1109 = vst [vmem:[%s2339_s9 + $0x8] sm:$0xff] %v1093_v45  ;;  %v1070_v58 = vmax.f32 %v1049_v49, 1e-24 }
 0x396   : > { %1693 = vrsqrt.f32 %v1068_v41  ;;  %v1051_v46 = vpop.xlane.xlu1 %1050 }
 0x397   : > { %v1684_v50 = vpop.eup %1683  ;;  %v1071_v54 = vmax.f32 %v1051_v46, 1e-24 }
 0x398   : > { %v1686_v59 = vpop.eup %1685  ;;  %v1097_v60 = vmul.f32 %v1684_v50, %v2396_v37  ;;  %v1053_v63 = vpop.xlane.xlu0 %1052 }
 0x399   : > { %v1096_v61 = vmul.f32 %v1686_v59, %v2388_v32  ;;  %1695 = vrsqrt.f32 %v1071_v54  ;;  %v1072_v2 = vmax.f32 %v1053_v63, 1e-24 }
 0x39a   : > { %1113 = vst [vmem:[%s2339_s9 + $0x28] sm:$0xff] %v1097_v60  ;;  %1697 = vrsqrt.f32 %v1070_v58  ;;  %v1055_v62 = vpop.xlane.xlu1 %1054 }
 0x39b   : > { %v1688_v0 = vpop.eup %1687  ;;  %1112 = vst [vmem:[%s2339_s9 + $0x20] sm:$0xff] %v1096_v61  ;;  %v1073_v1 = vmax.f32 %v1055_v62, 1e-24 }
 0x39c   : > { %v1690_v3 = vpop.eup %1689  ;;  %v1099_v4 = vmul.f32 %v1688_v0, %v2406_v43  ;;  %v1057_v7 = vpop.xlane.xlu0 %1056 }
 0x39d   : > { %v1098_v5 = vmul.f32 %v1690_v3, %v2398_v38  ;;  %1699 = vrsqrt.f32 %v1073_v1  ;;  %v1074_v10 = vmax.f32 %v1057_v7, 1e-24 }
 0x39e   : > { %1115 = vst [vmem:[%s2339_s9 + $0x38] sm:$0xff] %v1099_v4  ;;  %1701 = vrsqrt.f32 %v1072_v2  ;;  %v1059_v6 = vpop.xlane.xlu1 %1058 }
 0x39f   : > { %v1692_v8 = vpop.eup %1691  ;;  %1114 = vst [vmem:[%s2339_s9 + $0x30] sm:$0xff] %v1098_v5  ;;  %v1075_v9 = vmax.f32 %v1059_v6, 1e-24 }
 0x3a0   : > { %v1694_v11 = vpop.eup %1693  ;;  %v1101_v12 = vmul.f32 %v1692_v8, %v2414_v48 }
 0x3a1   : > { %v1100_v13 = vmul.f32 %v1694_v11, %v2412_v47  ;;  %1703 = vrsqrt.f32 %v1075_v9 }
 0x3a2   : > { %1117 = vst [vmem:[%s2339_s9 + $0x48] sm:$0xff] %v1101_v12  ;;  %1705 = vrsqrt.f32 %v1074_v10 }
 0x3a3   : > { %v1696_v14 = vpop.eup %1695  ;;  %1116 = vst [vmem:[%s2339_s9 + $0x40] sm:$0xff] %v1100_v13 }
 0x3a4   : > { %v1698_v15 = vpop.eup %1697  ;;  %v1103_v16 = vmul.f32 %v1696_v14, %v2420_v52 }
 0x3a5   : > { %v1102_v17 = vmul.f32 %v1698_v15, %v2418_v51 }
 0x3a6   : > { %1119 = vst [vmem:[%s2339_s9 + $0x58] sm:$0xff] %v1103_v16 }
 0x3a7   : > { %v1700_v18 = vpop.eup %1699  ;;  %1118 = vst [vmem:[%s2339_s9 + $0x50] sm:$0xff] %v1102_v17 }
 0x3a8   : > { %v1702_v19 = vpop.eup %1701  ;;  %v1105_v20 = vmul.f32 %v1700_v18, %v2428_v55 }
 0x3a9   : > { %v1104_v21 = vmul.f32 %v1702_v19, %v2422_v53 }
 0x3aa   : > { %1121 = vst [vmem:[%s2339_s9 + $0x68] sm:$0xff] %v1105_v20 }
 0x3ab   : > { %v1704_v22 = vpop.eup %1703  ;;  %1120 = vst [vmem:[%s2339_s9 + $0x60] sm:$0xff] %v1104_v21 }
 0x3ac   : > { %v1706_v25 = vpop.eup %1705  ;;  %v1107_v26 = vmul.f32 %v1704_v22, %v2438_v57 }
 0x3ad   : > { %v1106_v27 = vmul.f32 %v1706_v25, %v2430_v56 }
 0x3ae   : > { %1123 = vst [vmem:[%s2339_s9 + $0x78] sm:$0xff] %v1107_v26 }
 0x3af   : > { %1122 = vst [vmem:[%s2339_s9 + $0x70] sm:$0xff] %v1106_v27 }
 0x3b0 PF: > { %s2713_s6 = sld [smem:[#allocation19_spill]] }
 0x3b6   : > { %p1333_p4 = scmp.ge.s32.totalorder %s2713_s6, 1 }
 0x3b7   : > { %1128 = vst [vmem:[%s2339_s9] sm:$0xff] (!%p1333_p4), %v2380_v23  ;;  %1129 = vst [vmem:[%s2339_s9 + $0x8] sm:$0xff] (!%p1333_p4), %v2382_v24 }
 0x3b8   : > { %1127 = sbr.rel (%p1333_p4) target bundleno = 959 (0x3bf), region = 72  ;;  %1130 = vst [vmem:[%s2339_s9 + $0x10] sm:$0xff] (!%p1333_p4), %v2384_v30  ;;  %1131 = vst [vmem:[%s2339_s9 + $0x18] sm:$0xff] (!%p1333_p4), %v2386_v31 }
 0x3b9   : > { %1132 = vst [vmem:[%s2339_s9 + $0x20] sm:$0xff] (!%p1333_p4), %v2388_v32  ;;  %1133 = vst [vmem:[%s2339_s9 + $0x28] sm:$0xff] (!%p1333_p4), %v2396_v37 }
 0x3ba   : > { %1134 = vst [vmem:[%s2339_s9 + $0x30] sm:$0xff] (!%p1333_p4), %v2398_v38  ;;  %1135 = vst [vmem:[%s2339_s9 + $0x38] sm:$0xff] (!%p1333_p4), %v2406_v43 }
 0x3bb   : > { %1136 = vst [vmem:[%s2339_s9 + $0x40] sm:$0xff] (!%p1333_p4), %v2412_v47  ;;  %1137 = vst [vmem:[%s2339_s9 + $0x48] sm:$0xff] (!%p1333_p4), %v2414_v48 }
 0x3bc   : > { %1138 = vst [vmem:[%s2339_s9 + $0x50] sm:$0xff] (!%p1333_p4), %v2418_v51  ;;  %1139 = vst [vmem:[%s2339_s9 + $0x58] sm:$0xff] (!%p1333_p4), %v2420_v52 }
 0x3bd   : > { %1140 = vst [vmem:[%s2339_s9 + $0x60] sm:$0xff] (!%p1333_p4), %v2422_v53  ;;  %1141 = vst [vmem:[%s2339_s9 + $0x68] sm:$0xff] (!%p1333_p4), %v2428_v55 }
 0x3be   : > { %1142 = vst [vmem:[%s2339_s9 + $0x70] sm:$0xff] (!%p1333_p4), %v2430_v56  ;;  %1143 = vst [vmem:[%s2339_s9 + $0x78] sm:$0xff] (!%p1333_p4), %v2438_v57 }
 0x3bf PF: > { %s2714_s25 = sld [smem:[#allocation18_spill]]  ;;  %s2715_s26 = sld [smem:[#allocation28_spill]] }
 0x3c0   : > { %s1158_s24 = sshll.u32 %s2339_s9, 4  ;;  %s2555_s13 = scalar_lea.sflag [#allocation7], %s299_s0  ;;  %s2551_s24 = int_to_ptr.vmem [resolvable:$true] %s1158_s24 }
 0x3c1   : > { %s1795_s4 = scalar_lea.vmem %s2551_s24, 2048  ;;  %p2717_p12 = scmp.ne.s32.totalorder %s2683_s18, 0 }
 0x3c2   : > { %p1796_p10 = scmp.ne.s32.totalorder %s2551_s24, %s1795_s4  ;;  %s1975_s7 = smov [#allocation11]  }
 0x3c3   : > { %s1799_s27 = sshll.u32 %s1975_s7, 4  ;;  %s1800_s27 = int_to_ptr.vmem [resolvable:$false] %s1799_s27 }
 0x3c4   : > { %p1797_p8 = pnand %p1796_p10, %p2717_p12  ;;  %s1801_s6 = scalar_lea.vmem %s1800_s27, 4096 }
 0x3c5   : > { %s1341_s14 = sshll.u32 %s2714_s25, 11  ;;  %s2716_s8 = smov %s2715_s26 }
 0x3c6   : > { %s2548_s12 = scalar_lea.hbm %s2715_s26, %s1341_s14  ;;  %p1798_p13 = pneg %p1797_p8 }
 0x3c7   : > { %p1802_p1 = scmp.lt.s32.totalorder %s2551_s24, %s1800_s27  ;;  %p1803_p2 = scmp.lt.s32.totalorder %s1801_s6, %s1795_s4 }
 0x3c9   : > { %p1804_p5 = por %p1803_p2, %p1802_p1 }
 0x3cb   : > { %p1805_p3 = pnand %p1804_p5, %p1798_p13 }
 0x3cd   : > { %1808 = shalt.err (!%p1805_p3)
}
 0x3ce   : > { %s1809_s0 = scalar_lea.hbm %s2548_s12, 2048  ;;  %s1813_s14 = scalar_lea.hbm %s2716_s8, 4096 }
 0x3cf   : > { %p1810_p9 = scmp.ne.s32.totalorder %s2548_s12, %s1809_s0  ;;  %p1814_p7 = scmp.lt.u32.totalorder %s2548_s12, %s2716_s8 }
 0x3d0   : > { %p1815_p11 = scmp.lt.u32.totalorder %s1813_s14, %s1809_s0  ;;  %p1817_p10 = scmp.lt.u32.totalorder %s1809_s0, %s2548_s12 }
 0x3d1   : > { %p1811_p0 = pnand %p1810_p9, %p2717_p12 }
 0x3d2   : > { %p1816_p4 = por %p1815_p11, %p1814_p7 }
 0x3d3   : > { %p1812_p6 = pneg %p1811_p0 }
 0x3d4   : > { %p1818_p8 = por %p1817_p10, %p1816_p4 }
 0x3d6   : > { %p1819_p13 = pnand %p1818_p8, %p1812_p6 }
 0x3d8   : > { %1822 = shalt.err (!%p1819_p13)
}
 0x3d9   : > { %s1976_s26 = smov 128   ;;  %s1977_s4 = smov 8  }
 0x3da   : > { %1502 = dma.vmem_to_hbm [thread:$0]  (%p2717_p12), %s2551_s24, 2048, %s2548_s12, %s2555_s13, %s1976_s26, %s1976_s26, %s1977_s4  }
 0x3db PF: > { %p1522_p1 = scmp.ge.s32.totalorder %s1965_s30, 2  ;;  %s1173_s7 = sand.u32 1, %s1905_s15  }
 0x3dc   : > { %p2718_p2 = scmp.ne.s32.totalorder %s2684_s21, 0  ;;  %s1174_s27 = scalar_lea.sflag [#allocation7], %s1173_s7 }
 0x3de   : > { %p1516_p5 = pnand %p1522_p1, %p2718_p2 }
 0x3e0   : > { %1900 = dma.done.wait (!%p1516_p5), %s1174_s27, 2048  }
 0x3e1   : > { %1902 = vsyncadd (!%p1516_p5), %s1174_s27, 4294965248  ;;  %s21_s30 = sadd.s32 1, %s1965_s30   ;;  %s2720_s12 = sld [smem:[#allocation16_spill]] }
 0x3e2   : > { %p2584_p3 = scmp.ge.s32.totalorder %s21_s30, 10   ;;  %s2721_s24 = sld [smem:[#allocation20_spill]] }
 0x3e3   : > { %s2722_s25 = sld [smem:[#allocation21_spill]]  ;;  %s2723_s27 = sld [smem:[#allocation22_spill]] }
 0x3e4   : > { %s2724_s28 = sld [smem:[#allocation24_spill]]  ;;  %s2725_s15 = smov %s1909_s16 }
 0x3e5   : > { %s2726_s16 = smov %s1913_s17  ;;  %s2727_s17 = smov %s2195_s10 }
 0x3e6   : > { %s2728_s18 = smov %s1921_s19  ;;  %s2730_s20 = smov %s2745_s5 }
 0x3e7   : > { %s2729_s19 = smov %s2720_s12  ;;  %s2731_s21 = smov %s1933_s22 }
 0x3e8   : > { %s2732_s22 = smov %s1937_s23  ;;  %s2733_s23 = smov %s2119_s3 }
 0x3e9   : > { %s2734_s26 = smov %s1961_s29  ;;  %s2735_s29 = smov %s2743_s11 }
 0x3ea   :  { %20 = sbr.rel (!%p2584_p3) target bundleno = 17 (0x11), region = 125 }
 0x3f1   :  { %1179 = vsyncpa [#allocation6], 1 }
 0x3f2   :  { %1181 = vsyncpa [#allocation6 + $0x1], 1 }
 0x3f3   :  { %1182 = vsyncpa [#allocation9], 1 }
 0x3f4   :  { %1183 = vsyncpa [#allocation7], 1 }
 0x3f5   :  { %1185 = vsyncpa [#allocation7 + $0x1], 1 }

</bundles_post_ra>
